<compile_context>
chip_gen: v7x
topology: tpu7x:2x2x1
jax: 0.10.0
libtpu: 0.0.40
codegen_flags: <defaults>
</compile_context>

<pallas_src>
import functools

import jax
import jax.numpy as jnp
from jax.experimental import pallas as pl
from jax.experimental.pallas import tpu as pltpu


def _attention_kernel(xq_ref, xkt_ref, xv_ref,
                      wqt_ref, wk_ref, wvt_ref, wpt_ref, bp_ref,
                      xo_ref, attn_ref,
                      *, num_heads, block_b):
    H = num_heads
    Bb = block_b
    _, nq, c = xq_ref.shape            # (Bb, Nq, C)
    nk = xkt_ref.shape[2]              # (Bb, C, Nk)
    d = c // H
    mm = xq_ref.dtype                  # MXU input dtype (bf16 default, f32 for verification)
    exact = (mm == jnp.float32)

    # ---- Full-width projections (single deep-contraction matmuls, f32 accumulation) ----
    # Flatten the batch block so the MXU streams Bb*Nq / Bb*Nk LHS rows per RHS push.
    xq2d = xq_ref[...].reshape(Bb * nq, c)                       # (Bb*Nq, C)
    xv2d = xv_ref[...].reshape(Bb * nk, c)                       # (Bb*Nk, C)
    xkt = xkt_ref[...]                                           # (Bb, C, Nk)

    q_full = jnp.dot(xq2d, wqt_ref[...],
                     preferred_element_type=jnp.float32).astype(mm)   # (Bb*Nq, C), scale folded
    v_full = jnp.dot(xv2d, wvt_ref[...],
                     preferred_element_type=jnp.float32).astype(mm)   # (Bb*Nk, C)

    wk = wk_ref[...]                                             # (C, C) untransposed nn.Linear weight
    wpt = wpt_ref[...]                                           # (C, C) = Wp^T
    bp = bp_ref[...]                                             # (1, C) f32

    for b in range(Bb):                                          # static, small
        # K^T for this batch element: (C, C) @ (C, Nk) -> (C, Nk); head h lives on
        # sublane rows h*D:(h+1)*D, lane dim Nk is fully dense -> MXU-ready for scores.
        kt_b = jnp.dot(wk, xkt[b],
                       preferred_element_type=jnp.float32).astype(mm)  # (C, Nk)
        q_b = q_full[b * nq:(b + 1) * nq, :]                     # (Nq, C)
        v_b = v_full[b * nk:(b + 1) * nk, :]                     # (Nk, C)

        attn_sum = None
        ctx_parts = []
        for h in range(H):                                       # static unroll over heads
            # Scores: (Nq, D) lane slice  @  (D, Nk) sublane slice -> (Nq, Nk) f32.
            s = jnp.dot(q_b[:, h * d:(h + 1) * d],
                        kt_b[h * d:(h + 1) * d, :],
                        preferred_element_type=jnp.float32)      # scale already in q
            attn_sum = s if attn_sum is None else attn_sum + s

            # Softmax over keys, f32 VPU math; exact divide on the f32 verification path,
            # EUP approximate reciprocal on the bf16 production path.
            m = jnp.max(s, axis=-1, keepdims=True)
            e = jnp.exp(s - m)
            l = jnp.sum(e, axis=-1, keepdims=True)
            p = (e / l) if exact else (e * pl.reciprocal(l, approx=True))

            # Context: (Nq, Nk) @ (Nk, D) with full Nk contraction depth.
            ctx_parts.append(jnp.dot(p.astype(mm),
                                     v_b[:, h * d:(h + 1) * d],
                                     preferred_element_type=jnp.float32))   # (Nq, D) f32

        # attn_save.sum(dim=heads) / num_heads (pre-softmax scores, scale included).
        attn_ref[b] = attn_sum * (1.0 / H)

        # Lane-concat heads -> (Nq, C), then a single full-width output projection.
        ctx = jnp.concatenate(ctx_parts, axis=-1).astype(mm)     # (Nq, C)
        out = jnp.dot(ctx, wpt, preferred_element_type=jnp.float32) + bp
        xo_ref[b] = out.astype(xo_ref.dtype)


def _pick_block_b(batch):
    """Largest divisor of `batch` that still leaves >= 2 grid steps (v7x has 2 TCs)."""
    if batch <= 2:
        return 1
    for bb in range(min(batch // 2, 8), 0, -1):
        if batch % bb == 0:
            return bb
    return 1


def attention_forward(xq, xk, xv, params, *, num_heads, qk_scale=None,
                      mxu_dtype=jnp.bfloat16, out_dtype=jnp.float32, block_b=None):
    """Pallas-backed equivalent of Attention.forward.

    Returns (x.transpose(0, 1) -> [Nq, B, C], attn_save.sum(heads)/num_heads -> [B, Nq, Nk]).
    """
    B, Nq, C = xq.shape
    Nk = xk.shape[1]
    H = num_heads
    assert C % H == 0, "dim must be divisible by num_heads"
    D = C // H
    scale = qk_scale if qk_scale is not None else D ** (-0.5)
    f32 = jnp.float32

    if block_b is None:
        block_b = _pick_block_b(B)
    assert B % block_b == 0, "block_b must divide the batch size"

    # nn.Linear convention: y = x @ W.T + b, W has shape (out_features, in_features).
    # One-time wrapper-side weight prep: transpose q/v/proj weights, fold the qk scale
    # into Wq, keep Wk untransposed (the kernel computes K^T = Wk @ xk^T directly).
    wqt = (params["wq"].astype(f32).T * scale).astype(mxu_dtype)   # (C, C)
    wk_ = params["wk"].astype(mxu_dtype)                           # (C, C), untransposed
    wvt = params["wv"].astype(f32).T.astype(mxu_dtype)             # (C, C)
    wpt = params["wp"].astype(f32).T.astype(mxu_dtype)             # (C, C)
    bp2d = params["bp"].astype(f32).reshape(1, C)                  # (1, C) f32

    # bf16 MXU inputs by default (f32 accumulation inside the kernel); xk pre-transposed
    # once here so the kernel never transposes an activation tile.
    xq_c = xq.astype(mxu_dtype)
    xkt_c = jnp.swapaxes(xk, 1, 2).astype(mxu_dtype)               # (B, C, Nk)
    xv_c = xv.astype(mxu_dtype)

    kernel = functools.partial(_attention_kernel, num_heads=H, block_b=block_b)
    grid = (B // block_b,)

    x_out, attn_mean = pl.pallas_call(
        kernel,
        grid=grid,
        in_specs=[
            pl.BlockSpec((block_b, Nq, C), lambda b: (b, 0, 0)),   # xq
            pl.BlockSpec((block_b, C, Nk), lambda b: (b, 0, 0)),   # xk^T
            pl.BlockSpec((block_b, Nk, C), lambda b: (b, 0, 0)),   # xv
            pl.BlockSpec((C, C), lambda b: (0, 0)),                # Wq^T (scale folded)
            pl.BlockSpec((C, C), lambda b: (0, 0)),                # Wk (untransposed)
            pl.BlockSpec((C, C), lambda b: (0, 0)),                # Wv^T
            pl.BlockSpec((C, C), lambda b: (0, 0)),                # Wp^T
            pl.BlockSpec((1, C), lambda b: (0, 0)),                # b_proj
        ],
        out_specs=[
            pl.BlockSpec((block_b, Nq, C), lambda b: (b, 0, 0)),   # x       [B, Nq, C]
            pl.BlockSpec((block_b, Nq, Nk), lambda b: (b, 0, 0)),  # attn_save mean over heads
        ],
        out_shape=(
            jax.ShapeDtypeStruct((B, Nq, C), out_dtype),
            jax.ShapeDtypeStruct((B, Nq, Nk), jnp.float32),
        ),
        compiler_params=pltpu.CompilerParams(
            dimension_semantics=("parallel",),                     # >=2 steps -> both v7x TCs
            vmem_limit_bytes=32 * 1024 * 1024,
        ),
    )(xq_c, xkt_c, xv_c, wqt, wk_, wvt, wpt, bp2d)

    # PyTorch returns x.transpose(0, 1) -> [Nq, B, C]. The kernel writes the lane/sublane
    # dense (B, Nq, C) layout; the swap is one tiny XLA op outside the kernel.
    return jnp.transpose(x_out, (1, 0, 2)), attn_mean


def attention_reference(xq, xk, xv, params, *, num_heads, qk_scale=None):
    """Pure-JAX f32 reference matching the PyTorch module (for verification)."""
    B, Nq, C = xq.shape
    Nk = xk.shape[1]
    D = C // num_heads
    scale = qk_scale if qk_scale is not None else D ** (-0.5)

    q = (xq @ params["wq"].T).reshape(B, Nq, num_heads, D).transpose(0, 2, 1, 3)
    k = (xk @ params["wk"].T).reshape(B, Nk, num_heads, D).transpose(0, 2, 1, 3)
    v = (xv @ params["wv"].T).reshape(B, Nk, num_heads, D).transpose(0, 2, 1, 3)

    attn = jnp.einsum("bhqd,bhkd->bhqk", q, k) * scale
    attn_save = attn
    p = jax.nn.softmax(attn, axis=-1)
    x = jnp.einsum("bhqk,bhkd->bhqd", p, v).transpose(0, 2, 1, 3).reshape(B, Nq, C)
    x = x @ params["wp"].T + params["bp"]
    return jnp.transpose(x, (1, 0, 2)), attn_save.sum(axis=1) / num_heads


if __name__ == "__main__":
    # Small shapes consistent with the module's forward contract (lane-dense C / Nk).
    B, Nq, Nk, C = 2, 16, 128, 128
    num_heads = 8

    key = jax.random.PRNGKey(0)
    kq, kk, kv, kwq, kwk, kwv, kwp, kbp = jax.random.split(key, 8)

    xq = jax.random.normal(kq, (B, Nq, C), dtype=jnp.float32)
    xk = jax.random.normal(kk, (B, Nk, C), dtype=jnp.float32)
    xv = jax.random.normal(kv, (B, Nk, C), dtype=jnp.float32)

    init = 0.05
    params = {
        "wq": init * jax.random.normal(kwq, (C, C), dtype=jnp.float32),
        "wk": init * jax.random.normal(kwk, (C, C), dtype=jnp.float32),
        "wv": init * jax.random.normal(kwv, (C, C), dtype=jnp.float32),
        "wp": init * jax.random.normal(kwp, (C, C), dtype=jnp.float32),
        "bp": init * jax.random.normal(kbp, (C,), dtype=jnp.float32),
    }

    x_ref, attn_ref = attention_reference(xq, xk, xv, params, num_heads=num_heads)

    # f32 MXU path (tight check; exact softmax division).
    x32, a32 = attention_forward(xq, xk, xv, params, num_heads=num_heads,
                                 mxu_dtype=jnp.float32)
    jax.block_until_ready((x32, a32))
    assert x32.shape == (Nq, B, C)
    assert a32.shape == (B, Nq, Nk)
    assert jnp.allclose(x32, x_ref, atol=2e-3, rtol=2e-3)
    assert jnp.allclose(a32, attn_ref, atol=2e-3, rtol=2e-3)

    # bf16 MXU path (default; looser numerical check — bf16 P@V dominates the error).
    xbf, abf = attention_forward(xq, xk, xv, params, num_heads=num_heads,
                                 mxu_dtype=jnp.bfloat16)
    jax.block_until_ready((xbf, abf))
    assert xbf.shape == (Nq, B, C)
    assert abf.shape == (B, Nq, Nk)
    assert jnp.allclose(xbf, x_ref, atol=6e-2, rtol=6e-2)
    assert jnp.allclose(abf, attn_ref, atol=6e-2, rtol=6e-2)

    print("KERNEL_OK")
</pallas_src>

<mosaic_0001>
module attributes {stable_mosaic.version = 11 : i64} {
  func.func @_attention_kernel(%arg0: i32, %arg1: memref<1x16x128xf32, #tpu.memory_space<vmem>>, %arg2: memref<1x128x128xf32, #tpu.memory_space<vmem>>, %arg3: memref<1x128x128xf32, #tpu.memory_space<vmem>>, %arg4: memref<128x128xf32, #tpu.memory_space<vmem>>, %arg5: memref<128x128xf32, #tpu.memory_space<vmem>>, %arg6: memref<128x128xf32, #tpu.memory_space<vmem>>, %arg7: memref<128x128xf32, #tpu.memory_space<vmem>>, %arg8: memref<1x128xf32, #tpu.memory_space<vmem>>, %arg9: memref<1x16x128xf32, #tpu.memory_space<vmem>>, %arg10: memref<1x16x128xf32, #tpu.memory_space<vmem>>) attributes {dimension_semantics = [#tpu.dimension_semantics<parallel>], iteration_bounds = array<i64: 2>, scalar_prefetch = 0 : i64, scratch_operands = 0 : i64, tpu.core_type = #tpu.core_type<tc>, window_params = [{transform_indices = @transform_0, window_bounds = array<i64: 1, 16, 128>}, {transform_indices = @transform_1, window_bounds = array<i64: 1, 128, 128>}, {transform_indices = @transform_2, window_bounds = array<i64: 1, 128, 128>}, {pipeline_mode = #tpu.pipeline_mode<synchronous>, transform_indices = @transform_3, window_bounds = array<i64: 128, 128>}, {pipeline_mode = #tpu.pipeline_mode<synchronous>, transform_indices = @transform_4, window_bounds = array<i64: 128, 128>}, {pipeline_mode = #tpu.pipeline_mode<synchronous>, transform_indices = @transform_5, window_bounds = array<i64: 128, 128>}, {pipeline_mode = #tpu.pipeline_mode<synchronous>, transform_indices = @transform_6, window_bounds = array<i64: 128, 128>}, {pipeline_mode = #tpu.pipeline_mode<synchronous>, transform_indices = @transform_7, window_bounds = array<i64: 1, 128>}, {transform_indices = @transform_8, window_bounds = array<i64: 1, 16, 128>}, {transform_indices = @transform_9, window_bounds = array<i64: 1, 16, 128>}]} {
    %c0 = arith.constant 0 : index
    %c0_0 = arith.constant 0 : index
    %c0_1 = arith.constant 0 : index
    %0 = vector.load %arg1[%c0, %c0_0, %c0_1] : memref<1x16x128xf32, #tpu.memory_space<vmem>>, vector<1x16x128xf32>
    %1 = vector.shape_cast %0 : vector<1x16x128xf32> to vector<16x128xf32>
    %c0_2 = arith.constant 0 : index
    %c0_3 = arith.constant 0 : index
    %c0_4 = arith.constant 0 : index
    %2 = vector.load %arg3[%c0_2, %c0_3, %c0_4] : memref<1x128x128xf32, #tpu.memory_space<vmem>>, vector<1x128x128xf32>
    %3 = vector.shape_cast %2 : vector<1x128x128xf32> to vector<128x128xf32>
    %c0_5 = arith.constant 0 : index
    %c0_6 = arith.constant 0 : index
    %c0_7 = arith.constant 0 : index
    %4 = vector.load %arg2[%c0_5, %c0_6, %c0_7] : memref<1x128x128xf32, #tpu.memory_space<vmem>>, vector<1x128x128xf32>
    %c0_8 = arith.constant 0 : index
    %c0_9 = arith.constant 0 : index
    %5 = vector.load %arg4[%c0_8, %c0_9] : memref<128x128xf32, #tpu.memory_space<vmem>>, vector<128x128xf32>
    %cst = arith.constant dense<0.000000e+00> : vector<16x128xf32>
    %6 = tpu.matmul %1, %5, %cst {dimension_numbers = #tpu.dot_dimension_numbers<[1], [0], [0], [1], [0, 0, 1, 1], [], []>} : vector<16x128xf32>, vector<128x128xf32>, vector<16x128xf32> -> vector<16x128xf32>
    %c0_10 = arith.constant 0 : index
    %c0_11 = arith.constant 0 : index
    %7 = vector.load %arg6[%c0_10, %c0_11] : memref<128x128xf32, #tpu.memory_space<vmem>>, vector<128x128xf32>
    %cst_12 = arith.constant dense<0.000000e+00> : vector<128x128xf32>
    %8 = tpu.matmul %3, %7, %cst_12 {dimension_numbers = #tpu.dot_dimension_numbers<[1], [0], [0], [1], [0, 0, 1, 1], [], []>} : vector<128x128xf32>, vector<128x128xf32>, vector<128x128xf32> -> vector<128x128xf32>
    %c0_13 = arith.constant 0 : index
    %c0_14 = arith.constant 0 : index
    %9 = vector.load %arg5[%c0_13, %c0_14] : memref<128x128xf32, #tpu.memory_space<vmem>>, vector<128x128xf32>
    %c0_15 = arith.constant 0 : index
    %c0_16 = arith.constant 0 : index
    %10 = vector.load %arg7[%c0_15, %c0_16] : memref<128x128xf32, #tpu.memory_space<vmem>>, vector<128x128xf32>
    %c0_17 = arith.constant 0 : index
    %c0_18 = arith.constant 0 : index
    %11 = vector.load %arg8[%c0_17, %c0_18] : memref<1x128xf32, #tpu.memory_space<vmem>>, vector<1x128xf32>
    %12 = vector.shape_cast %4 : vector<1x128x128xf32> to vector<128x128xf32>
    %cst_19 = arith.constant dense<0.000000e+00> : vector<128x128xf32>
    %13 = tpu.matmul %9, %12, %cst_19 {dimension_numbers = #tpu.dot_dimension_numbers<[1], [0], [0], [1], [0, 0, 1, 1], [], []>} : vector<128x128xf32>, vector<128x128xf32>, vector<128x128xf32> -> vector<128x128xf32>
    %14 = vector.extract_strided_slice %6 {offsets = [0, 0], sizes = [16, 16], strides = [1, 1]} : vector<16x128xf32> to vector<16x16xf32>
    %15 = vector.extract_strided_slice %13 {offsets = [0, 0], sizes = [16, 128], strides = [1, 1]} : vector<128x128xf32> to vector<16x128xf32>
    %cst_20 = arith.constant dense<0.000000e+00> : vector<16x128xf32>
    %16 = tpu.matmul %14, %15, %cst_20 {dimension_numbers = #tpu.dot_dimension_numbers<[1], [0], [0], [1], [0, 0, 1, 1], [], []>} : vector<16x16xf32>, vector<16x128xf32>, vector<16x128xf32> -> vector<16x128xf32>
    %cst_21 = arith.constant dense<0xFF800000> : vector<16xf32>
    %17 = vector.multi_reduction <maximumf>, %16, %cst_21 [1] : vector<16x128xf32> to vector<16xf32>
    %18 = vector.shape_cast %17 : vector<16xf32> to vector<16x1xf32>
    %19 = vector.broadcast %18 : vector<16x1xf32> to vector<16x128xf32>
    %20 = arith.subf %16, %19 : vector<16x128xf32>
    %21 = math.exp %20 : vector<16x128xf32>
    %cst_22 = arith.constant dense<0.000000e+00> : vector<16xf32>
    %22 = vector.multi_reduction <add>, %21, %cst_22 [1] : vector<16x128xf32> to vector<16xf32>
    %23 = vector.shape_cast %22 : vector<16xf32> to vector<16x1xf32>
    %24 = vector.broadcast %23 : vector<16x1xf32> to vector<16x128xf32>
    %25 = arith.divf %21, %24 : vector<16x128xf32>
    %26 = vector.extract_strided_slice %8 {offsets = [0, 0], sizes = [128, 16], strides = [1, 1]} : vector<128x128xf32> to vector<128x16xf32>
    %cst_23 = arith.constant dense<0.000000e+00> : vector<16x16xf32>
    %27 = tpu.matmul %25, %26, %cst_23 {dimension_numbers = #tpu.dot_dimension_numbers<[1], [0], [0], [1], [0, 0, 1, 1], [], []>} : vector<16x128xf32>, vector<128x16xf32>, vector<16x16xf32> -> vector<16x16xf32>
    %28 = vector.extract_strided_slice %6 {offsets = [0, 16], sizes = [16, 16], strides = [1, 1]} : vector<16x128xf32> to vector<16x16xf32>
    %29 = vector.extract_strided_slice %13 {offsets = [16, 0], sizes = [16, 128], strides = [1, 1]} : vector<128x128xf32> to vector<16x128xf32>
    %cst_24 = arith.constant dense<0.000000e+00> : vector<16x128xf32>
    %30 = tpu.matmul %28, %29, %cst_24 {dimension_numbers = #tpu.dot_dimension_numbers<[1], [0], [0], [1], [0, 0, 1, 1], [], []>} : vector<16x16xf32>, vector<16x128xf32>, vector<16x128xf32> -> vector<16x128xf32>
    %31 = arith.addf %16, %30 : vector<16x128xf32>
    %cst_25 = arith.constant dense<0xFF800000> : vector<16xf32>
    %32 = vector.multi_reduction <maximumf>, %30, %cst_25 [1] : vector<16x128xf32> to vector<16xf32>
    %33 = vector.shape_cast %32 : vector<16xf32> to vector<16x1xf32>
    %34 = vector.broadcast %33 : vector<16x1xf32> to vector<16x128xf32>
    %35 = arith.subf %30, %34 : vector<16x128xf32>
    %36 = math.exp %35 : vector<16x128xf32>
    %cst_26 = arith.constant dense<0.000000e+00> : vector<16xf32>
    %37 = vector.multi_reduction <add>, %36, %cst_26 [1] : vector<16x128xf32> to vector<16xf32>
    %38 = vector.shape_cast %37 : vector<16xf32> to vector<16x1xf32>
    %39 = vector.broadcast %38 : vector<16x1xf32> to vector<16x128xf32>
    %40 = arith.divf %36, %39 : vector<16x128xf32>
    %41 = vector.extract_strided_slice %8 {offsets = [0, 16], sizes = [128, 16], strides = [1, 1]} : vector<128x128xf32> to vector<128x16xf32>
    %cst_27 = arith.constant dense<0.000000e+00> : vector<16x16xf32>
    %42 = tpu.matmul %40, %41, %cst_27 {dimension_numbers = #tpu.dot_dimension_numbers<[1], [0], [0], [1], [0, 0, 1, 1], [], []>} : vector<16x128xf32>, vector<128x16xf32>, vector<16x16xf32> -> vector<16x16xf32>
    %43 = vector.extract_strided_slice %6 {offsets = [0, 32], sizes = [16, 16], strides = [1, 1]} : vector<16x128xf32> to vector<16x16xf32>
    %44 = vector.extract_strided_slice %13 {offsets = [32, 0], sizes = [16, 128], strides = [1, 1]} : vector<128x128xf32> to vector<16x128xf32>
    %cst_28 = arith.constant dense<0.000000e+00> : vector<16x128xf32>
    %45 = tpu.matmul %43, %44, %cst_28 {dimension_numbers = #tpu.dot_dimension_numbers<[1], [0], [0], [1], [0, 0, 1, 1], [], []>} : vector<16x16xf32>, vector<16x128xf32>, vector<16x128xf32> -> vector<16x128xf32>
    %46 = arith.addf %31, %45 : vector<16x128xf32>
    %cst_29 = arith.constant dense<0xFF800000> : vector<16xf32>
    %47 = vector.multi_reduction <maximumf>, %45, %cst_29 [1] : vector<16x128xf32> to vector<16xf32>
    %48 = vector.shape_cast %47 : vector<16xf32> to vector<16x1xf32>
    %49 = vector.broadcast %48 : vector<16x1xf32> to vector<16x128xf32>
    %50 = arith.subf %45, %49 : vector<16x128xf32>
    %51 = math.exp %50 : vector<16x128xf32>
    %cst_30 = arith.constant dense<0.000000e+00> : vector<16xf32>
    %52 = vector.multi_reduction <add>, %51, %cst_30 [1] : vector<16x128xf32> to vector<16xf32>
    %53 = vector.shape_cast %52 : vector<16xf32> to vector<16x1xf32>
    %54 = vector.broadcast %53 : vector<16x1xf32> to vector<16x128xf32>
    %55 = arith.divf %51, %54 : vector<16x128xf32>
    %56 = vector.extract_strided_slice %8 {offsets = [0, 32], sizes = [128, 16], strides = [1, 1]} : vector<128x128xf32> to vector<128x16xf32>
    %cst_31 = arith.constant dense<0.000000e+00> : vector<16x16xf32>
    %57 = tpu.matmul %55, %56, %cst_31 {dimension_numbers = #tpu.dot_dimension_numbers<[1], [0], [0], [1], [0, 0, 1, 1], [], []>} : vector<16x128xf32>, vector<128x16xf32>, vector<16x16xf32> -> vector<16x16xf32>
    %58 = vector.extract_strided_slice %6 {offsets = [0, 48], sizes = [16, 16], strides = [1, 1]} : vector<16x128xf32> to vector<16x16xf32>
    %59 = vector.extract_strided_slice %13 {offsets = [48, 0], sizes = [16, 128], strides = [1, 1]} : vector<128x128xf32> to vector<16x128xf32>
    %cst_32 = arith.constant dense<0.000000e+00> : vector<16x128xf32>
    %60 = tpu.matmul %58, %59, %cst_32 {dimension_numbers = #tpu.dot_dimension_numbers<[1], [0], [0], [1], [0, 0, 1, 1], [], []>} : vector<16x16xf32>, vector<16x128xf32>, vector<16x128xf32> -> vector<16x128xf32>
    %61 = arith.addf %46, %60 : vector<16x128xf32>
    %cst_33 = arith.constant dense<0xFF800000> : vector<16xf32>
    %62 = vector.multi_reduction <maximumf>, %60, %cst_33 [1] : vector<16x128xf32> to vector<16xf32>
    %63 = vector.shape_cast %62 : vector<16xf32> to vector<16x1xf32>
    %64 = vector.broadcast %63 : vector<16x1xf32> to vector<16x128xf32>
    %65 = arith.subf %60, %64 : vector<16x128xf32>
    %66 = math.exp %65 : vector<16x128xf32>
    %cst_34 = arith.constant dense<0.000000e+00> : vector<16xf32>
    %67 = vector.multi_reduction <add>, %66, %cst_34 [1] : vector<16x128xf32> to vector<16xf32>
    %68 = vector.shape_cast %67 : vector<16xf32> to vector<16x1xf32>
    %69 = vector.broadcast %68 : vector<16x1xf32> to vector<16x128xf32>
    %70 = arith.divf %66, %69 : vector<16x128xf32>
    %71 = vector.extract_strided_slice %8 {offsets = [0, 48], sizes = [128, 16], strides = [1, 1]} : vector<128x128xf32> to vector<128x16xf32>
    %cst_35 = arith.constant dense<0.000000e+00> : vector<16x16xf32>
    %72 = tpu.matmul %70, %71, %cst_35 {dimension_numbers = #tpu.dot_dimension_numbers<[1], [0], [0], [1], [0, 0, 1, 1], [], []>} : vector<16x128xf32>, vector<128x16xf32>, vector<16x16xf32> -> vector<16x16xf32>
    %73 = vector.extract_strided_slice %6 {offsets = [0, 64], sizes = [16, 16], strides = [1, 1]} : vector<16x128xf32> to vector<16x16xf32>
    %74 = vector.extract_strided_slice %13 {offsets = [64, 0], sizes = [16, 128], strides = [1, 1]} : vector<128x128xf32> to vector<16x128xf32>
    %cst_36 = arith.constant dense<0.000000e+00> : vector<16x128xf32>
    %75 = tpu.matmul %73, %74, %cst_36 {dimension_numbers = #tpu.dot_dimension_numbers<[1], [0], [0], [1], [0, 0, 1, 1], [], []>} : vector<16x16xf32>, vector<16x128xf32>, vector<16x128xf32> -> vector<16x128xf32>
    %76 = arith.addf %61, %75 : vector<16x128xf32>
    %cst_37 = arith.constant dense<0xFF800000> : vector<16xf32>
    %77 = vector.multi_reduction <maximumf>, %75, %cst_37 [1] : vector<16x128xf32> to vector<16xf32>
    %78 = vector.shape_cast %77 : vector<16xf32> to vector<16x1xf32>
    %79 = vector.broadcast %78 : vector<16x1xf32> to vector<16x128xf32>
    %80 = arith.subf %75, %79 : vector<16x128xf32>
    %81 = math.exp %80 : vector<16x128xf32>
    %cst_38 = arith.constant dense<0.000000e+00> : vector<16xf32>
    %82 = vector.multi_reduction <add>, %81, %cst_38 [1] : vector<16x128xf32> to vector<16xf32>
    %83 = vector.shape_cast %82 : vector<16xf32> to vector<16x1xf32>
    %84 = vector.broadcast %83 : vector<16x1xf32> to vector<16x128xf32>
    %85 = arith.divf %81, %84 : vector<16x128xf32>
    %86 = vector.extract_strided_slice %8 {offsets = [0, 64], sizes = [128, 16], strides = [1, 1]} : vector<128x128xf32> to vector<128x16xf32>
    %cst_39 = arith.constant dense<0.000000e+00> : vector<16x16xf32>
    %87 = tpu.matmul %85, %86, %cst_39 {dimension_numbers = #tpu.dot_dimension_numbers<[1], [0], [0], [1], [0, 0, 1, 1], [], []>} : vector<16x128xf32>, vector<128x16xf32>, vector<16x16xf32> -> vector<16x16xf32>
    %88 = vector.extract_strided_slice %6 {offsets = [0, 80], sizes = [16, 16], strides = [1, 1]} : vector<16x128xf32> to vector<16x16xf32>
    %89 = vector.extract_strided_slice %13 {offsets = [80, 0], sizes = [16, 128], strides = [1, 1]} : vector<128x128xf32> to vector<16x128xf32>
    %cst_40 = arith.constant dense<0.000000e+00> : vector<16x128xf32>
    %90 = tpu.matmul %88, %89, %cst_40 {dimension_numbers = #tpu.dot_dimension_numbers<[1], [0], [0], [1], [0, 0, 1, 1], [], []>} : vector<16x16xf32>, vector<16x128xf32>, vector<16x128xf32> -> vector<16x128xf32>
    %91 = arith.addf %76, %90 : vector<16x128xf32>
    %cst_41 = arith.constant dense<0xFF800000> : vector<16xf32>
    %92 = vector.multi_reduction <maximumf>, %90, %cst_41 [1] : vector<16x128xf32> to vector<16xf32>
    %93 = vector.shape_cast %92 : vector<16xf32> to vector<16x1xf32>
    %94 = vector.broadcast %93 : vector<16x1xf32> to vector<16x128xf32>
    %95 = arith.subf %90, %94 : vector<16x128xf32>
    %96 = math.exp %95 : vector<16x128xf32>
    %cst_42 = arith.constant dense<0.000000e+00> : vector<16xf32>
    %97 = vector.multi_reduction <add>, %96, %cst_42 [1] : vector<16x128xf32> to vector<16xf32>
    %98 = vector.shape_cast %97 : vector<16xf32> to vector<16x1xf32>
    %99 = vector.broadcast %98 : vector<16x1xf32> to vector<16x128xf32>
    %100 = arith.divf %96, %99 : vector<16x128xf32>
    %101 = vector.extract_strided_slice %8 {offsets = [0, 80], sizes = [128, 16], strides = [1, 1]} : vector<128x128xf32> to vector<128x16xf32>
    %cst_43 = arith.constant dense<0.000000e+00> : vector<16x16xf32>
    %102 = tpu.matmul %100, %101, %cst_43 {dimension_numbers = #tpu.dot_dimension_numbers<[1], [0], [0], [1], [0, 0, 1, 1], [], []>} : vector<16x128xf32>, vector<128x16xf32>, vector<16x16xf32> -> vector<16x16xf32>
    %103 = vector.extract_strided_slice %6 {offsets = [0, 96], sizes = [16, 16], strides = [1, 1]} : vector<16x128xf32> to vector<16x16xf32>
    %104 = vector.extract_strided_slice %13 {offsets = [96, 0], sizes = [16, 128], strides = [1, 1]} : vector<128x128xf32> to vector<16x128xf32>
    %cst_44 = arith.constant dense<0.000000e+00> : vector<16x128xf32>
    %105 = tpu.matmul %103, %104, %cst_44 {dimension_numbers = #tpu.dot_dimension_numbers<[1], [0], [0], [1], [0, 0, 1, 1], [], []>} : vector<16x16xf32>, vector<16x128xf32>, vector<16x128xf32> -> vector<16x128xf32>
    %106 = arith.addf %91, %105 : vector<16x128xf32>
    %cst_45 = arith.constant dense<0xFF800000> : vector<16xf32>
    %107 = vector.multi_reduction <maximumf>, %105, %cst_45 [1] : vector<16x128xf32> to vector<16xf32>
    %108 = vector.shape_cast %107 : vector<16xf32> to vector<16x1xf32>
    %109 = vector.broadcast %108 : vector<16x1xf32> to vector<16x128xf32>
    %110 = arith.subf %105, %109 : vector<16x128xf32>
    %111 = math.exp %110 : vector<16x128xf32>
    %cst_46 = arith.constant dense<0.000000e+00> : vector<16xf32>
    %112 = vector.multi_reduction <add>, %111, %cst_46 [1] : vector<16x128xf32> to vector<16xf32>
    %113 = vector.shape_cast %112 : vector<16xf32> to vector<16x1xf32>
    %114 = vector.broadcast %113 : vector<16x1xf32> to vector<16x128xf32>
    %115 = arith.divf %111, %114 : vector<16x128xf32>
    %116 = vector.extract_strided_slice %8 {offsets = [0, 96], sizes = [128, 16], strides = [1, 1]} : vector<128x128xf32> to vector<128x16xf32>
    %cst_47 = arith.constant dense<0.000000e+00> : vector<16x16xf32>
    %117 = tpu.matmul %115, %116, %cst_47 {dimension_numbers = #tpu.dot_dimension_numbers<[1], [0], [0], [1], [0, 0, 1, 1], [], []>} : vector<16x128xf32>, vector<128x16xf32>, vector<16x16xf32> -> vector<16x16xf32>
    %118 = vector.extract_strided_slice %6 {offsets = [0, 112], sizes = [16, 16], strides = [1, 1]} : vector<16x128xf32> to vector<16x16xf32>
    %119 = vector.extract_strided_slice %13 {offsets = [112, 0], sizes = [16, 128], strides = [1, 1]} : vector<128x128xf32> to vector<16x128xf32>
    %cst_48 = arith.constant dense<0.000000e+00> : vector<16x128xf32>
    %120 = tpu.matmul %118, %119, %cst_48 {dimension_numbers = #tpu.dot_dimension_numbers<[1], [0], [0], [1], [0, 0, 1, 1], [], []>} : vector<16x16xf32>, vector<16x128xf32>, vector<16x128xf32> -> vector<16x128xf32>
    %121 = arith.addf %106, %120 : vector<16x128xf32>
    %cst_49 = arith.constant dense<0xFF800000> : vector<16xf32>
    %122 = vector.multi_reduction <maximumf>, %120, %cst_49 [1] : vector<16x128xf32> to vector<16xf32>
    %123 = vector.shape_cast %122 : vector<16xf32> to vector<16x1xf32>
    %124 = vector.broadcast %123 : vector<16x1xf32> to vector<16x128xf32>
    %125 = arith.subf %120, %124 : vector<16x128xf32>
    %126 = math.exp %125 : vector<16x128xf32>
    %cst_50 = arith.constant dense<0.000000e+00> : vector<16xf32>
    %127 = vector.multi_reduction <add>, %126, %cst_50 [1] : vector<16x128xf32> to vector<16xf32>
    %128 = vector.shape_cast %127 : vector<16xf32> to vector<16x1xf32>
    %129 = vector.broadcast %128 : vector<16x1xf32> to vector<16x128xf32>
    %130 = arith.divf %126, %129 : vector<16x128xf32>
    %131 = vector.extract_strided_slice %8 {offsets = [0, 112], sizes = [128, 16], strides = [1, 1]} : vector<128x128xf32> to vector<128x16xf32>
    %cst_51 = arith.constant dense<0.000000e+00> : vector<16x16xf32>
    %132 = tpu.matmul %130, %131, %cst_51 {dimension_numbers = #tpu.dot_dimension_numbers<[1], [0], [0], [1], [0, 0, 1, 1], [], []>} : vector<16x128xf32>, vector<128x16xf32>, vector<16x16xf32> -> vector<16x16xf32>
    %cst_52 = arith.constant 1.250000e-01 : f32
    %133 = vector.broadcast %cst_52 : f32 to vector<16x128xf32>
    %134 = arith.mulf %121, %133 : vector<16x128xf32>
    %c0_53 = arith.constant 0 : index
    %c0_54 = arith.constant 0 : index
    %c0_55 = arith.constant 0 : index
    %135 = vector.load %arg10[%c0_53, %c0_54, %c0_55] : memref<1x16x128xf32, #tpu.memory_space<vmem>>, vector<1x16x128xf32>
    %136 = vector.shape_cast %135 : vector<1x16x128xf32> to vector<16x128xf32>
    %137 = vector.shape_cast %134 : vector<16x128xf32> to vector<1x16x128xf32>
    tpu.vector_store %arg10[%c0_53, %c0_54, %c0_55], %137 {strides = array<i32>} : memref<1x16x128xf32, #tpu.memory_space<vmem>>, vector<1x16x128xf32>,
    %138 = tpu.concatenate %27, %42, %57, %72, %87, %102, %117, %132 in 1 : vector<16x16xf32>, vector<16x16xf32>, vector<16x16xf32>, vector<16x16xf32>, vector<16x16xf32>, vector<16x16xf32>, vector<16x16xf32>, vector<16x16xf32> -> vector<16x128xf32>
    %cst_56 = arith.constant dense<0.000000e+00> : vector<16x128xf32>
    %139 = tpu.matmul %138, %10, %cst_56 {dimension_numbers = #tpu.dot_dimension_numbers<[1], [0], [0], [1], [0, 0, 1, 1], [], []>} : vector<16x128xf32>, vector<128x128xf32>, vector<16x128xf32> -> vector<16x128xf32>
    %140 = vector.broadcast %11 : vector<1x128xf32> to vector<16x128xf32>
    %141 = arith.addf %139, %140 : vector<16x128xf32>
    %c0_57 = arith.constant 0 : index
    %c0_58 = arith.constant 0 : index
    %c0_59 = arith.constant 0 : index
    %142 = vector.load %arg9[%c0_57, %c0_58, %c0_59] : memref<1x16x128xf32, #tpu.memory_space<vmem>>, vector<1x16x128xf32>
    %143 = vector.shape_cast %142 : vector<1x16x128xf32> to vector<16x128xf32>
    %144 = vector.shape_cast %141 : vector<16x128xf32> to vector<1x16x128xf32>
    tpu.vector_store %arg9[%c0_57, %c0_58, %c0_59], %144 {strides = array<i32>} : memref<1x16x128xf32, #tpu.memory_space<vmem>>, vector<1x16x128xf32>,
    return
  }
  func.func @transform_0(%arg0: i32) -> (i32, i32, i32) {
    %c0_i32 = arith.constant 0 : i32
    %c0_i32_0 = arith.constant 0 : i32
    %c0_i32_1 = arith.constant 0 : i32
    return %arg0, %c0_i32, %c0_i32_0 : i32, i32, i32
  }
  func.func @transform_1(%arg0: i32) -> (i32, i32, i32) {
    %c0_i32 = arith.constant 0 : i32
    %c0_i32_0 = arith.constant 0 : i32
    %c0_i32_1 = arith.constant 0 : i32
    return %arg0, %c0_i32, %c0_i32_0 : i32, i32, i32
  }
  func.func @transform_2(%arg0: i32) -> (i32, i32, i32) {
    %c0_i32 = arith.constant 0 : i32
    %c0_i32_0 = arith.constant 0 : i32
    %c0_i32_1 = arith.constant 0 : i32
    return %arg0, %c0_i32, %c0_i32_0 : i32, i32, i32
  }
  func.func @transform_3(%arg0: i32) -> (i32, i32) {
    %c0_i32 = arith.constant 0 : i32
    %c0_i32_0 = arith.constant 0 : i32
    %c0_i32_1 = arith.constant 0 : i32
    return %c0_i32, %c0_i32_0 : i32, i32
  }
  func.func @transform_4(%arg0: i32) -> (i32, i32) {
    %c0_i32 = arith.constant 0 : i32
    %c0_i32_0 = arith.constant 0 : i32
    %c0_i32_1 = arith.constant 0 : i32
    return %c0_i32, %c0_i32_0 : i32, i32
  }
  func.func @transform_5(%arg0: i32) -> (i32, i32) {
    %c0_i32 = arith.constant 0 : i32
    %c0_i32_0 = arith.constant 0 : i32
    %c0_i32_1 = arith.constant 0 : i32
    return %c0_i32, %c0_i32_0 : i32, i32
  }
  func.func @transform_6(%arg0: i32) -> (i32, i32) {
    %c0_i32 = arith.constant 0 : i32
    %c0_i32_0 = arith.constant 0 : i32
    %c0_i32_1 = arith.constant 0 : i32
    return %c0_i32, %c0_i32_0 : i32, i32
  }
  func.func @transform_7(%arg0: i32) -> (i32, i32) {
    %c0_i32 = arith.constant 0 : i32
    %c0_i32_0 = arith.constant 0 : i32
    %c0_i32_1 = arith.constant 0 : i32
    return %c0_i32, %c0_i32_0 : i32, i32
  }
  func.func @transform_8(%arg0: i32) -> (i32, i32, i32) {
    %c0_i32 = arith.constant 0 : i32
    %c0_i32_0 = arith.constant 0 : i32
    %c0_i32_1 = arith.constant 0 : i32
    return %arg0, %c0_i32, %c0_i32_0 : i32, i32, i32
  }
  func.func @transform_9(%arg0: i32) -> (i32, i32, i32) {
    %c0_i32 = arith.constant 0 : i32
    %c0_i32_0 = arith.constant 0 : i32
    %c0_i32_1 = arith.constant 0 : i32
    return %arg0, %c0_i32, %c0_i32_0 : i32, i32, i32
  }
}

</mosaic_0001>

<bundles_post_ra>
// kernel: tpu_custom_call.1
= control target key start
LH: loop header
LB: loop body
LE: loop exit
PB: predicated region body
PF: predicated region fallthrough
CT: control target
= control target key end

     0   :  { %s6051_s0 = inlined_call_operand.hbm [shape: f32[2,16,128], index: 0, kind: input, shape index: {}]   ;;  %s6052_s1 = inlined_call_operand.hbm [shape: f32[2,128,128], index: 1, kind: input, shape index: {}]   ;;  %s6053_s2 = inlined_call_operand.hbm [shape: f32[2,128,128], index: 2, kind: input, shape index: {}]   ;;  %s6054_s3 = inlined_call_operand.hbm [shape: f32[128,128], index: 3, kind: input, shape index: {}]   ;;  %s6055_s4 = inlined_call_operand.hbm [shape: f32[128,128], index: 4, kind: input, shape index: {}]   ;;  %s6056_s5 = inlined_call_operand.hbm [shape: f32[128,128], index: 5, kind: input, shape index: {}]   ;;  %s6057_s6 = inlined_call_operand.hbm [shape: f32[128,128], index: 6, kind: input, shape index: {}]   ;;  %s6058_s7 = inlined_call_operand.vmem [shape: f32[1,128], index: 7, kind: input, shape index: {}]   ;;  %s6059_s8 = inlined_call_operand.hbm [shape: f32[2,16,128], index: 8, kind: output, shape index: {0}]   ;;  %s6060_s9 = inlined_call_operand.hbm [shape: f32[2,16,128], index: 9, kind: output, shape index: {1}]  }
   0x1   :  { %6087 = sst [smem:[#allocation29_spill]] %s6052_s1 }
   0x2   :  { %6088 = sst [smem:[#allocation30_spill]] %s6054_s3 }
   0x3   :  { %6089 = sst [smem:[#allocation31_spill]] %s6056_s5 }
   0x4   :  { %6090 = sst [smem:[#allocation32_spill]] %s6058_s7 }
   0x5   :  { %6091 = sst [smem:[#allocation33_spill]] %s6059_s8 }
   0x6   :  { %6092 = sst [smem:[#allocation34_spill]] %s6060_s9 }
   0x7   :  { %15 = vsyncpa [#allocation3], 0 }
   0x8   :  { %17 = vsyncpa [#allocation3 + $0x1], 0 }
   0x9   :  { %18 = vsyncpa [#allocation6], 0 }
   0xa   :  { %20 = vsyncpa [#allocation6 + $0x1], 0 }
   0xb   :  { %21 = vsyncpa [#allocation9], 0 }
   0xc   :  { %22 = vsyncpa [#allocation12], 0 }
   0xd   :  { %23 = vsyncpa [#allocation4], 0 }
   0xe   :  { %25 = vsyncpa [#allocation4 + $0x1], 0 }
   0xf   :  { %26 = vsyncpa [#allocation16], 0 }
  0x10   :  { %28 = vsyncpa [#allocation16 + $0x1], 0  ;;  %s5260_s30 = smov 0   ;;  %s5262_s10 = smov 0  }
  0x11   :  { %s5264_s11 = smov 0   ;;  %s5266_s12 = smov 0  }
  0x12 LB: > { %6093 = sst [smem:[#allocation23_spill]] %s5176_s30  ;;  %s5281_s13 = sadd.s32 4294967295, %s5188_s12   ;;  %s5188_s12 = sphi %s5266_s12, %s6133_s12   ;;  %s5184_s11 = sphi %s5264_s11, %s6135_s11   ;;  %s5180_s10 = sphi %s5262_s10, %s6137_s10   ;;  %s5176_s30 = sphi %s5260_s30, %s6136_s30  }
  0x13   : > { %6094 = sst [smem:[#allocation24_spill]] %s5184_s11  ;;  %s3118_s14 = sadd.s32 4294967294, %s5188_s12  }
  0x14   : > { %p54_p0 = scmp.ne.s32.totalorder %s5180_s10, %s5176_s30  ;;  %p6061_p1 = scmp.eq.s32.totalorder %s5281_s13, 0 }
  0x15   : > { %p241_p3 = scmp.eq.s32.totalorder %s3118_s14, 1  ;;  %p3119_p5 = scmp.ge.s32.totalorder %s5188_s12, 1 }
  0x16   : > { %p5290_p4 = por %p6061_p1, %p54_p0  ;;  %p274_p7 = scmp.lt.s32.totalorder %s5188_s12, 3 }
  0x17   : > { %p5295_p6 = por %p241_p3, %p54_p0  ;;  %s5190_s18 = smov [#allocation8]  }
  0x18   : > { %s6095_s15 = scalar_select %p5290_p4, 1, 0 }
  0x19   : > { %s6096_s16 = scalar_select %p5295_p6, 1, 0 }
  0x1a   : > { %p5300_p8 = pnand %p3119_p5, %p274_p7  ;;  %s286_s19 = sshll.u32 %s5190_s18, 4  ;;  %s5304_s19 = int_to_ptr.vmem [resolvable:$true] %s286_s19 }
  0x1b   : > { %6097 = sst [smem:[#allocation25_spill]] %s6096_s16  ;;  %s5191_s21 = smov [#allocation11]  }
  0x1c   : > { %s6098_s17 = scalar_select %p5300_p8, 1, 0 }
  0x1d   : > { %p4410_p9 = pneg %p5300_p8  ;;  %s312_s22 = sshll.u32 %s5191_s21, 4  ;;  %s5315_s22 = int_to_ptr.vmem [resolvable:$true] %s312_s22 }
  0x1e   : > { %s6100_s3 = sld [smem:[#allocation30_spill]] }
  0x1f   : > { %p5311_p11 = pnand %p4410_p9, %p6061_p1 }
  0x21   : > { %s6099_s20 = scalar_select %p5311_p11, 1, 0 }
  0x22   : > { %p5325_p13 = pneg %p5311_p11 }
  0x24   : > { %s4876_s25 = scalar_lea.hbm %s6100_s3, 2048 }
  0x25   : > { %p4877_p12 = scmp.ne.s32.totalorder %s6100_s3, %s4876_s25  ;;  %p4883_p5 = scmp.lt.u32.totalorder %s4876_s25, %s6100_s3 }
  0x26   : > { %s6101_s28 = scalar_select %p5325_p13, 1, 0 }
  0x27   : > { %p4879_p0 = pnand %p5325_p13, %p4877_p12 }
  0x29   : > { %p4880_p3 = pneg %p4879_p0 }
  0x2b   : > { %p4885_p7 = pnand %p4883_p5, %p4880_p3 }
  0x2d   : > { %4888 = shalt.err (!%p4885_p7)
}
  0x2e   : > { %s4889_s18 = scalar_lea.vmem %s5304_s19, 2048  ;;  %p4897_p2 = scmp.lt.s32.totalorder %s5304_s19, %s5304_s19 }
  0x2f   : > { %p4890_p9 = scmp.ne.s32.totalorder %s5304_s19, %s4889_s18  ;;  %p4898_p6 = scmp.lt.s32.totalorder %s4889_s18, %s4889_s18 }
  0x31   : > { %p4892_p10 = pnand %p4890_p9, %p5325_p13  ;;  %p4899_p12 = por %p4898_p6, %p4897_p2 }
  0x33   : > { %p4893_p1 = pneg %p4892_p10 }
  0x35   : > { %p4900_p0 = pnand %p4899_p12, %p4893_p1 }
  0x37   : > { %4903 = shalt.err (!%p4900_p0)
}
  0x38   : > { %s6064_s21 = smov 128   ;;  %s6066_s23 = smov 8  }
  0x39   : > { %4413 = dma.hbm_to_vmem [thread:$0]  (!%p5311_p11), %s6100_s3, 2048, %s5304_s19, [#allocation9], %s6064_s21, %s6064_s21, %s6066_s23  }
  0x3a   : > { %s6102_s5 = sld [smem:[#allocation31_spill]] }
  0x40   : > { %s4904_s29 = scalar_lea.hbm %s6102_s5, 2048 }
  0x41   : > { %p4905_p1 = scmp.ne.s32.totalorder %s6102_s5, %s4904_s29  ;;  %p4911_p10 = scmp.lt.u32.totalorder %s4904_s29, %s6102_s5 }
  0x43   : > { %p4907_p2 = pnand %p4905_p1, %p5325_p13 }
  0x45   : > { %p4908_p6 = pneg %p4907_p2 }
  0x47   : > { %p4913_p3 = pnand %p4911_p10, %p4908_p6 }
  0x49   : > { %4916 = shalt.err (!%p4913_p3)
}
  0x4a   : > { %s4917_s19 = scalar_lea.vmem %s5315_s22, 2048  ;;  %p4925_p12 = scmp.lt.s32.totalorder %s5315_s22, %s5315_s22 }
  0x4b   : > { %p4918_p5 = scmp.ne.s32.totalorder %s5315_s22, %s4917_s19  ;;  %p4926_p0 = scmp.lt.s32.totalorder %s4917_s19, %s4917_s19 }
  0x4d   : > { %p4920_p7 = pnand %p4918_p5, %p5325_p13  ;;  %p4927_p1 = por %p4926_p0, %p4925_p12 }
  0x4f   : > { %p4921_p9 = pneg %p4920_p7 }
  0x51   : > { %p4928_p2 = pnand %p4927_p1, %p4921_p9 }
  0x53   : > { %4931 = shalt.err (!%p4928_p2)
}
  0x54   : > { %4419 = dma.hbm_to_vmem [thread:$0]  (!%p5311_p11), %s6102_s5, 2048, %s5315_s22, [#allocation12], %s6064_s21, %s6064_s21, %s6066_s23  }
  0x55   : > { %s5376_s24 = sadd.s32 1, %s5188_s12   ;;  %s41_s25 = sadd.s32 1, %s5184_s11 }
  0x56   : > { %6103 = sst [smem:[#allocation26_spill]] %s5376_s24  ;;  %s38_s26 = ssub.s32 %s5188_s12, %s5376_s24 }
  0x57   : > { %p48_p6 = scmp.ne.s32.totalorder %s5184_s11, %s5180_s10  ;;  %p39_p10 = scmp.eq.s32.totalorder %s38_s26, 0 }
  0x58   : > { %p49_p3 = scmp.eq.s32.totalorder %s5188_s12, 0  ;;  %p6104_p5 = scmp.eq.s32.totalorder %s5281_s13, 1 }
  0x59   : > { %p4444_p9 = scmp.lt.s32.totalorder %s5188_s12, 2  ;;  %s5395_s14 = sand.u32 1, %s5184_s11  }
  0x5a   : > { %p5386_p7 = por %p6104_p5, %p48_p6  ;;  %p50_p12 = por %p49_p3, %p48_p6 }
  0x5b   : > { %s5392_s29 = scalar_select %p39_p10, %s5184_s11, %s41_s25  }
  0x5c   : > { %s6105_s27 = scalar_select %p5386_p7, 1, 0 }
  0x5d   : > { %6107 = sst [smem:[#allocation28_spill]] %s5392_s29  ;;  %s363_s22 = sand.u32 1, %s5188_s12  }
  0x5e   : > { %6106 = sst [smem:[#allocation27_spill]] %s6105_s27  ;;  %s6071_s18 = sshll.u32 %s5395_s14, 7 }
  0x5f   : > { %p5399_p0 = pnand %p4444_p9, %p50_p12  ;;  %s3170_s30 = sshll.u32 %s5188_s12, 11 }
  0x60   : > { %s6109_s1 = sld [smem:[#allocation29_spill]]  ;;  %s367_s25 = scalar_lea.vmem [#allocation5], %s6071_s18 }
  0x61   : > { %s6108_s19 = scalar_select %p5399_p0, 1, 0 }
  0x62   : > { %s374_s23 = sshll.u32 %s367_s25, 4  ;;  %s5416_s29 = scalar_lea.hbm %s6053_s2, %s3170_s30  ;;  %s5411_s23 = int_to_ptr.vmem [resolvable:$true] %s374_s23 }
  0x63   : > { %s5418_s11 = scalar_lea.sflag [#allocation6], %s363_s22  ;;  %p5424_p2 = pneg %p5399_p0 }
  0x65   : > { %s6110_s16 = scalar_select %p5424_p2, 1, 0 }
  0x66   : > { %s5407_s21 = scalar_lea.hbm %s6109_s1, %s3170_s30  ;;  %s4937_s18 = scalar_lea.hbm %s6109_s1, 4096 }
  0x67   : > { %s4932_s24 = scalar_lea.hbm %s5407_s21, 2048  ;;  %p4938_p3 = scmp.lt.u32.totalorder %s5407_s21, %s6109_s1 }
  0x68   : > { %p4933_p1 = scmp.ne.s32.totalorder %s5407_s21, %s4932_s24  ;;  %p4939_p5 = scmp.lt.u32.totalorder %s4937_s18, %s4932_s24 }
  0x69   : > { %p4941_p12 = scmp.lt.u32.totalorder %s4932_s24, %s5407_s21 }
  0x6a   : > { %p4935_p6 = pnand %p5424_p2, %p4933_p1  ;;  %p4940_p9 = por %p4939_p5, %p4938_p3 }
  0x6c   : > { %p4936_p10 = pneg %p4935_p6  ;;  %p4942_p7 = por %p4941_p12, %p4940_p9 }
  0x6e   : > { %p4943_p4 = pnand %p4942_p7, %p4936_p10 }
  0x70   : > { %4946 = shalt.err (!%p4943_p4)
}
  0x71   : > { %s4947_s22 = scalar_lea.vmem %s5411_s23, 2048  ;;  %s5194_s30 = smov [#allocation5]  }
  0x72   : > { %p4948_p1 = scmp.ne.s32.totalorder %s5411_s23, %s4947_s22  ;;  %s4952_s26 = sshll.u32 %s5194_s30, 4  ;;  %s4953_s26 = int_to_ptr.vmem [resolvable:$false] %s4952_s26 }
  0x73   : > { %s4954_s25 = scalar_lea.vmem %s4953_s26, 4096  ;;  %p4955_p11 = scmp.lt.s32.totalorder %s5411_s23, %s4953_s26 }
  0x74   : > { %p4950_p6 = pnand %p4948_p1, %p5424_p2  ;;  %p4956_p13 = scmp.lt.s32.totalorder %s4954_s25, %s4947_s22 }
  0x76   : > { %p4951_p8 = pneg %p4950_p6  ;;  %p4957_p3 = por %p4956_p13, %p4955_p11 }
  0x78   : > { %p4958_p5 = pnand %p4957_p3, %p4951_p8 }
  0x7a   : > { %4961 = shalt.err (!%p4958_p5)
}
  0x7b   : > { %s6111_s24 = smov 8   ;;  %s6112_s18 = smov 128  }
  0x7c   : > { %4429 = dma.hbm_to_vmem [thread:$0]  (!%p5399_p0), %s5407_s21, 2048, %s5411_s23, %s5418_s11, %s6112_s18, %s6112_s18, %s6111_s24  }
  0x7d   : > { %s6113_s3 = sshll.u32 %s5395_s14, 7  ;;  %s5195_s22 = smov [#allocation10]  }
  0x7e   : > { %s388_s5 = scalar_lea.vmem [#allocation7], %s6113_s3  ;;  %s299_s26 = sshll.u32 %s5195_s22, 4  ;;  %s300_s26 = int_to_ptr.vmem [resolvable:$true] %s299_s26 }
  0x7f   : > { %s395_s30 = sshll.u32 %s388_s5, 4  ;;  %s4962_s8 = scalar_lea.hbm %s6055_s4, 2048  ;;  %s5453_s30 = int_to_ptr.vmem [resolvable:$true] %s395_s30 }
  0x80   : > { %p4963_p4 = scmp.ne.s32.totalorder %s6055_s4, %s4962_s8  ;;  %p6114_p8 = scmp.ne.s32.totalorder %s6101_s28, 0 }
  0x81   : > { %p4969_p7 = scmp.lt.u32.totalorder %s4962_s8, %s6055_s4 }
  0x82   : > { %p4965_p11 = pnand %p4963_p4, %p6114_p8 }
  0x84   : > { %p4966_p13 = pneg %p4965_p11 }
  0x86   : > { %p4971_p10 = pnand %p4969_p7, %p4966_p13 }
  0x88   : > { %4974 = shalt.err (!%p4971_p10)
}
  0x89   : > { %s4975_s3 = scalar_lea.vmem %s300_s26, 2048  ;;  %p4983_p6 = scmp.lt.s32.totalorder %s300_s26, %s300_s26 }
  0x8a   : > { %p4976_p9 = scmp.ne.s32.totalorder %s300_s26, %s4975_s3  ;;  %p4984_p3 = scmp.lt.s32.totalorder %s4975_s3, %s4975_s3 }
  0x8c   : > { %p4978_p12 = pnand %p4976_p9, %p6114_p8  ;;  %p4985_p5 = por %p4984_p3, %p4983_p6 }
  0x8e   : > { %p4979_p1 = pneg %p4978_p12 }
  0x90   : > { %p4986_p0 = pnand %p4985_p5, %p4979_p1 }
  0x92   : > { %4989 = shalt.err (!%p4986_p0)
}
  0x93   : > { %p6115_p4 = scmp.ne.s32.totalorder %s6099_s20, 0  ;;  %s5196_s8 = smov [#allocation13]  }
  0x94   : > { %s325_s9 = sshll.u32 %s5196_s8, 4  ;;  %s3125_s5 = sshll.u32 %s5395_s14, 4  ;;  %s326_s9 = int_to_ptr.vmem [resolvable:$true] %s325_s9 }
  0x95   : > { %4416 = dma.hbm_to_vmem [thread:$0]  (!%p6115_p4), %s6055_s4, 2048, %s300_s26, [#allocation9], %s6112_s18, %s6112_s18, %s6111_s24  }
  0x96   : > { %s4990_s21 = scalar_lea.hbm %s6057_s6, 2048 }
  0x97   : > { %p4991_p0 = scmp.ne.s32.totalorder %s6057_s6, %s4990_s21  ;;  %p4997_p7 = scmp.lt.u32.totalorder %s4990_s21, %s6057_s6 }
  0x99   : > { %p4993_p11 = pnand %p4991_p0, %p6114_p8 }
  0x9b   : > { %p4994_p13 = pneg %p4993_p11 }
  0x9d   : > { %p4999_p10 = pnand %p4997_p7, %p4994_p13 }
  0x9f   : > { %5002 = shalt.err (!%p4999_p10)
}
  0xa0   : > { %s5003_s26 = scalar_lea.vmem %s326_s9, 2048  ;;  %p5011_p6 = scmp.lt.s32.totalorder %s326_s9, %s326_s9 }
  0xa1   : > { %p5004_p9 = scmp.ne.s32.totalorder %s326_s9, %s5003_s26  ;;  %p5012_p3 = scmp.lt.s32.totalorder %s5003_s26, %s5003_s26 }
  0xa3   : > { %p5006_p12 = pnand %p5004_p9, %p6114_p8  ;;  %p5013_p5 = por %p5012_p3, %p5011_p6 }
  0xa5   : > { %p5007_p1 = pneg %p5006_p12 }
  0xa7   : > { %p5014_p2 = pnand %p5013_p5, %p5007_p1 }
  0xa9   : > { %5017 = shalt.err (!%p5014_p2)
}
  0xaa   : > { %4422 = dma.hbm_to_vmem [thread:$0]  (!%p6115_p4), %s6057_s6, 2048, %s326_s9, [#allocation12], %s6112_s18, %s6112_s18, %s6111_s24  }
  0xab   : > { %s3169_s28 = sshll.u32 %s5188_s12, 8  ;;  %s346_s20 = scalar_lea.vmem [#allocation2], %s3125_s5 }
  0xac   : > { %s5502_s25 = scalar_lea.hbm %s6051_s0, %s3169_s28  ;;  %s353_s21 = sshll.u32 %s346_s20, 4  ;;  %s5504_s21 = int_to_ptr.vmem [resolvable:$true] %s353_s21 }
  0xad   : > { %s343_s23 = scalar_lea.sflag [#allocation3], %s5395_s14  ;;  %s5018_s3 = scalar_lea.hbm %s5502_s25, 256 }
  0xae   : > { %p5019_p2 = scmp.ne.s32.totalorder %s5502_s25, %s5018_s3  ;;  %p6116_p8 = scmp.ne.s32.totalorder %s6110_s16, 0 }
  0xaf   : > { %s5023_s26 = scalar_lea.hbm %s6051_s0, 512  ;;  %p5024_p11 = scmp.lt.u32.totalorder %s5502_s25, %s6051_s0 }
  0xb0   : > { %p5021_p0 = pnand %p5019_p2, %p6116_p8  ;;  %p5025_p13 = scmp.lt.u32.totalorder %s5023_s26, %s5018_s3 }
  0xb1   : > { %p5027_p10 = scmp.lt.u32.totalorder %s5018_s3, %s5502_s25 }
  0xb2   : > { %p5022_p4 = pneg %p5021_p0  ;;  %p5026_p7 = por %p5025_p13, %p5024_p11 }
  0xb4   : > { %p5028_p9 = por %p5027_p10, %p5026_p7 }
  0xb6   : > { %p5029_p12 = pnand %p5028_p9, %p5022_p4 }
  0xb8   : > { %5032 = shalt.err (!%p5029_p12)
}
  0xb9   : > { %s5033_s5 = scalar_lea.vmem %s5504_s21, 256  ;;  %s5197_s28 = smov [#allocation2]  }
  0xba   : > { %p5034_p1 = scmp.ne.s32.totalorder %s5504_s21, %s5033_s5  ;;  %s5038_s8 = sshll.u32 %s5197_s28, 4  ;;  %s5039_s8 = int_to_ptr.vmem [resolvable:$false] %s5038_s8 }
  0xbb   : > { %s5040_s22 = scalar_lea.vmem %s5039_s8, 512  ;;  %p5041_p5 = scmp.lt.s32.totalorder %s5504_s21, %s5039_s8 }
  0xbc   : > { %p5036_p6 = pnand %p5034_p1, %p6116_p8  ;;  %p5042_p2 = scmp.lt.s32.totalorder %s5040_s22, %s5033_s5 }
  0xbe   : > { %p5037_p3 = pneg %p5036_p6  ;;  %p5043_p0 = por %p5042_p2, %p5041_p5 }
  0xc0   : > { %p5044_p11 = pnand %p5043_p0, %p5037_p3 }
  0xc2   : > { %5047 = shalt.err (!%p5044_p11)
}
  0xc3   : > { %p6117_p4 = scmp.ne.s32.totalorder %s6108_s19, 0  ;;  %s5048_s20 = scalar_lea.hbm %s5416_s29, 2048 }
  0xc4   : > { %p5049_p13 = scmp.ne.s32.totalorder %s5416_s29, %s5048_s20  ;;  %s5053_s1 = scalar_lea.hbm %s6053_s2, 4096 }
  0xc5   : > { %4426 = dma.hbm_to_vmem [thread:$0]  (!%p6117_p4), %s5502_s25, 256, %s5504_s21, %s343_s23, %s6112_s18, %s6112_s18, %s6111_s24  }
  0xc6   : > { %p5051_p7 = pnand %p5049_p13, %p6116_p8  ;;  %p5054_p9 = scmp.lt.u32.totalorder %s5416_s29, %s6053_s2 }
  0xc7   : > { %p5055_p12 = scmp.lt.u32.totalorder %s5053_s1, %s5048_s20  ;;  %p5057_p6 = scmp.lt.u32.totalorder %s5048_s20, %s5416_s29 }
  0xc8   : > { %p5052_p10 = pneg %p5051_p7 }
  0xc9   : > { %p5056_p1 = por %p5055_p12, %p5054_p9 }
  0xcb   : > { %p5058_p3 = por %p5057_p6, %p5056_p1 }
  0xcd   : > { %p5059_p5 = pnand %p5058_p3, %p5052_p10 }
  0xcf   : > { %5062 = shalt.err (!%p5059_p5)
}
  0xd0   : > { %s5063_s14 = scalar_lea.vmem %s5453_s30, 2048  ;;  %s5198_s25 = smov [#allocation7]  }
  0xd1   : > { %p5064_p2 = scmp.ne.s32.totalorder %s5453_s30, %s5063_s14  ;;  %s5068_s21 = sshll.u32 %s5198_s25, 4  ;;  %s5069_s21 = int_to_ptr.vmem [resolvable:$false] %s5068_s21 }
  0xd2   : > { %s5070_s23 = scalar_lea.vmem %s5069_s21, 4096  ;;  %p5071_p13 = scmp.lt.s32.totalorder %s5453_s30, %s5069_s21 }
  0xd3   : > { %p5066_p0 = pnand %p5064_p2, %p6116_p8  ;;  %p5072_p7 = scmp.lt.s32.totalorder %s5070_s23, %s5063_s14 }
  0xd5   : > { %p5067_p11 = pneg %p5066_p0  ;;  %p5073_p9 = por %p5072_p7, %p5071_p13 }
  0xd7   : > { %p5074_p12 = pnand %p5073_p9, %p5067_p11 }
  0xd9   : > { %5077 = shalt.err (!%p5074_p12)
}
  0xda   : > { %4432 = dma.hbm_to_vmem [thread:$0]  (!%p6117_p4), %s5416_s29, 2048, %s5453_s30, %s5418_s11, %s6112_s18, %s6112_s18, %s6111_s24  }
  0xdb   : > { %p6118_p8 = scmp.ne.s32.totalorder %s6098_s17, 0 }
  0xdc   : > { %s5561_s16 = sand.u32 (!%p6118_p8), 1, %s5180_s10   ;;  %p6119_p10 = scmp.ne.s32.totalorder (!%p6118_p8), %s6095_s15, 0 }
  0xdd   : > { %407 = sbr.rel (%p6118_p8) target bundleno = 3327 (0xcff), region = 52  ;;  %s5564_s7 = sshll.u32 (!%p6118_p8), %s5561_s16, 4 }
  0xde   : > { %s410_s19 = scalar_lea.sflag (!%p6118_p8), [#allocation3], %s5561_s16  ;;  %s413_s5 = scalar_lea.vmem (!%p6118_p8), [#allocation2], %s5564_s7 }
  0xe4   : > { %5151 = dma.done.wait (%p6119_p10), %s410_s19, 256  }
  0xe5   : > { %5153 = vsyncadd (%p6119_p10), %s410_s19, 4294967040  ;;  %s418_s11 = sand.u32 1, %s5281_s13   ;;  %s3136_s17 = sshll.u32 %s5561_s16, 7 }
  0xe6   : > { %s419_s29 = scalar_lea.sflag [#allocation6], %s418_s11  ;;  %s5574_s24 = scalar_lea.vmem [#allocation5], %s3136_s17 }
  0xe7   : > { %5155 = dma.done.wait (%p6119_p10), %s419_s29, 4096  }
  0xe8   : > { %5157 = vsyncadd (%p6119_p10), %s419_s29, 4294963200  ;;  %s5580_s18 = scalar_lea.vmem [#allocation7], %s3136_s17  ;;  %p6120_p4 = scmp.eq.s32.totalorder %s5281_s13, 0 }
  0xea   : > { %5159 = dma.done.wait (%p6120_p4), [#allocation9], 4096   ;;  %p6121_p1 = pmov %p6120_p4 }
  0xec   : > { %5161 = vsyncadd (%p6121_p1), [#allocation9], 4294963200  ;;  %p6122_p6 = pmov %p6121_p1 }
  0xed   : > { %p6123_p3 = pmov %p6121_p1 }
  0xee   : > { %5163 = dma.done.wait (%p6122_p6), [#allocation12], 4096  }
  0xef   : > { %5165 = vsyncadd (%p6123_p3), [#allocation12], 4294963200  ;;  %v531_v0 = vld [vmem:[#allocation8] sm:$0xff]  ;;  %v532_v1 = vld [vmem:[#allocation8 + $0x8] sm:$0xff]  ;;  %vm961_vm0 = vcmask 130048   ;;  %s5199_s15 = smov 112  }
  0xf0   : > { %v533_v2 = vld [vmem:[#allocation8 + $0x10] sm:$0xff]  ;;  %v3968_v3 = vpack.c.bf16 %v532_v1, %v531_v0  ;;  %v534_v4 = vld [vmem:[#allocation8 + $0x18] sm:$0xff]  ;;  %v535_v6 = vld [vmem:[#allocation8 + $0x20] sm:$0xff]  ;;  %s5200_s30 = smov 96   ;;  %s5201_s28 = smov 80   ;;  %vm2796_vm1 = vcmask 261120  }
  0xf1   : > { %v3972_v5 = vpack.c.bf16 %v534_v4, %v533_v2  ;;  %v536_v7 = vld [vmem:[#allocation8 + $0x28] sm:$0xff]  ;;  %v497_v9 = vld [vmem:[%s413_s5] sm:$0xff]  ;;  %v538_v11 = vld [vmem:[#allocation8 + $0x38] sm:$0xff]  ;;  %s5202_s8 = smov 64   ;;  %s5203_s22 = smov 48   ;;  %vm2799_vm2 = vcmask 392192  }
  0xf2   : > { %3969 = vmatprep.subr.bf16.mxu0 %v3968_v3  ;;  %v3976_v8 = vpack.c.bf16 %v536_v7, %v535_v6  ;;  %v537_v10 = vld [vmem:[#allocation8 + $0x30] sm:$0xff]  ;;  %3482 = vmatprep.mubr.f32.mxu0 %v497_v9  ;;  %v539_v13 = vld [vmem:[#allocation8 + $0x40] sm:$0xff]  ;;  %v540_v14 = vld [vmem:[#allocation8 + $0x48] sm:$0xff]  ;;  %s5204_s20 = smov 32   ;;  %s5205_s3 = smov 16   ;;  %vm2802_vm3 = vcmask 523264  }
  0xf3   : > { %3971 = vmatpush3.bf16.msra.mxu0 %v3968_v3  ;;  %v3980_v12 = vpack.c.bf16 %v538_v11, %v537_v10  ;;  %v622_v15 = vld [vmem:[#allocation11] sm:$0xff]  ;;  %v3984_v16 = vpack.c.bf16 %v540_v14, %v539_v13  ;;  %v623_v17 = vld [vmem:[#allocation11 + $0x8] sm:$0xff]  ;;  %v624_v18 = vld [vmem:[#allocation11 + $0x10] sm:$0xff]  ;;  %s5869_s9 = scalar_lea.vmem [#allocation15], %s5564_s7  ;;  %vm2805_vm4 = vcmask 654336   ;;  %vm2808_vm5 = vcmask 785408  }
  0xf4   : > { %3973 = vmatprep.subr.bf16.mxu0 %v3972_v5  ;;  %v625_v19 = vld [vmem:[#allocation11 + $0x18] sm:$0xff]  ;;  %v541_v20 = vld [vmem:[#allocation8 + $0x50] sm:$0xff]  ;;  %v4000_v22 = vpack.c.bf16 %v623_v17, %v622_v15  ;;  %v626_v24 = vld [vmem:[#allocation11 + $0x20] sm:$0xff]  ;;  %vm2811_vm6 = vcmask 916480   ;;  %s6124_s1 = sld [smem:[#allocation27_spill]]  ;;  %s2932_s26 = sshll.u32 %s5869_s9, 4  ;;  %s5956_s26 = int_to_ptr.vmem [resolvable:$true] %s2932_s26 }
  0xf5   : > { %v542_v21 = vld [vmem:[#allocation8 + $0x58] sm:$0xff]  ;;  %v4004_v23 = vpack.c.bf16 %v625_v19, %v624_v18  ;;  %v627_v25 = vld [vmem:[#allocation11 + $0x28] sm:$0xff]  ;;  %v543_v27 = vld [vmem:[#allocation8 + $0x60] sm:$0xff]  ;;  %s3172_s27 = sshll.u32 %s5281_s13, 8  ;;  %s6125_s21 = sld [smem:[#allocation34_spill]] }
  0xf6   : > { %4001 = vmatprep.subr.bf16.mxu1 %v4000_v22  ;;  %v3988_v26 = vpack.c.bf16 %v542_v21, %v541_v20  ;;  %v544_v28 = vld [vmem:[#allocation8 + $0x68] sm:$0xff]  ;;  %v4008_v29 = vpack.c.bf16 %v627_v25, %v626_v24  ;;  %v499_v30 = vld [vmem:[%s5580_s18] sm:$0xff]  ;;  %v628_v31 = vld [vmem:[#allocation11 + $0x30] sm:$0xff]  ;;  %s2903_s19 = scalar_lea.sflag [#allocation16], %s5561_s16  ;;  %s5206_s11 = smov [#allocation15]  }
  0xf7   : > { %3975 = vmatpush3.bf16.msra.mxu0 %v3972_v5  ;;  %4003 = vmatpush3.bf16.msra.mxu1 %v4000_v22  ;;  %v629_v32 = vld [vmem:[#allocation11 + $0x38] sm:$0xff]  ;;  %v3992_v33 = vpack.c.bf16 %v544_v28, %v543_v27  ;;  %v545_v34 = vld [vmem:[#allocation8 + $0x70] sm:$0xff]  ;;  %v630_v37 = vld [vmem:[#allocation11 + $0x40] sm:$0xff]  ;;  %s5082_s17 = sshll.u32 %s5206_s11, 4  ;;  %s5083_s17 = int_to_ptr.vmem [resolvable:$false] %s5082_s17 }
  0xf8   : > { %3977 = vmatprep.subr.bf16.mxu0 %v3976_v8  ;;  %4005 = vmatprep.subr.bf16.mxu1 %v4004_v23  ;;  %v546_v35 = vld [vmem:[#allocation8 + $0x78] sm:$0xff]  ;;  %v4012_v36 = vpack.c.bf16 %v629_v32, %v628_v31  ;;  %v631_v38 = vld [vmem:[#allocation11 + $0x48] sm:$0xff]  ;;  %v515_v40 = vld [vmem:[%s5574_s24] sm:$0xff]  ;;  %s5084_s29 = scalar_lea.vmem %s5083_s17, 512  ;;  %p5085_p13 = scmp.lt.s32.totalorder %s5956_s26, %s5083_s17 }
  0xf9   : > { %3517 = vmatprep.mubr.f32.mxu1 %v499_v30  ;;  %v3996_v39 = vpack.c.bf16 %v546_v35, %v545_v34  ;;  %v516_v41 = vld [vmem:[%s5574_s24 + $0x8] sm:$0xff]  ;;  %v4016_v42 = vpack.c.bf16 %v631_v38, %v630_v37  ;;  %v632_v43 = vld [vmem:[#allocation11 + $0x50] sm:$0xff]  ;;  %v633_v44 = vld [vmem:[#allocation11 + $0x58] sm:$0xff] }
  0xfa   : > { %v4032_v45 = vpack.c.bf16 %v516_v41, %v515_v40  ;;  %v517_v46 = vld [vmem:[%s5574_s24 + $0x10] sm:$0xff]  ;;  %v518_v47 = vld [vmem:[%s5574_s24 + $0x18] sm:$0xff]  ;;  %v4020_v48 = vpack.c.bf16 %v633_v44, %v632_v43  ;;  %v634_v49 = vld [vmem:[#allocation11 + $0x60] sm:$0xff]  ;;  %p6126_p2 = scmp.ne.s32.totalorder %s6124_s1, 0 }
  0xfb   : > { %3979 = vmatpush3.bf16.msra.mxu0 %v3976_v8  ;;  %4007 = vmatpush3.bf16.msra.mxu1 %v4004_v23  ;;  %v635_v50 = vld [vmem:[#allocation11 + $0x68] sm:$0xff]  ;;  %v4036_v52 = vpack.c.bf16 %v518_v47, %v517_v46  ;;  %v783_v53 = vld [vmem:[#allocation10] sm:$0xff]  ;;  %v636_v57 = vld [vmem:[#allocation11 + $0x70] sm:$0xff]  ;;  %s5964_s23 = scalar_lea.hbm %s6125_s21, %s3172_s27 }
  0xfc   : > { %3981 = vmatprep.subr.bf16.mxu0 %v3980_v12  ;;  %4009 = vmatprep.subr.bf16.mxu1 %v4008_v29  ;;  %v498_v51 = vld [vmem:[%s413_s5 + $0x8] sm:$0xff]  ;;  %v519_v54 = vld [vmem:[%s5574_s24 + $0x20] sm:$0xff]  ;;  %v4024_v56 = vpack.c.bf16 %v635_v50, %v634_v49  ;;  %v521_v60 = vld [vmem:[%s5574_s24 + $0x30] sm:$0xff]  ;;  %s5078_s5 = scalar_lea.vmem %s5956_s26, 256 }
  0xfd   : > { %v520_v55 = vld [vmem:[%s5574_s24 + $0x28] sm:$0xff]  ;;  %v637_v58 = vld [vmem:[#allocation11 + $0x78] sm:$0xff]  ;;  %v523_v0 = vld [vmem:[%s5574_s24 + $0x40] sm:$0xff]  ;;  %p5079_p5 = scmp.ne.s32.totalorder %s5956_s26, %s5078_s5  ;;  %p5086_p7 = scmp.lt.s32.totalorder %s5084_s29, %s5078_s5 }
  0xfe   : > { %v4040_v59 = vpack.c.bf16 %v520_v55, %v519_v54  ;;  %v522_v61 = vld [vmem:[%s5574_s24 + $0x38] sm:$0xff]  ;;  %v4028_v62 = vpack.c.bf16 %v637_v58, %v636_v57  ;;  %v524_v1 = vld [vmem:[%s5574_s24 + $0x48] sm:$0xff]  ;;  %v525_v4 = vld [vmem:[%s5574_s24 + $0x50] sm:$0xff] }
  0xff   : > { %3983 = vmatpush3.bf16.msra.mxu0 %v3980_v12  ;;  %4011 = vmatpush3.bf16.msra.mxu1 %v4008_v29  ;;  %v4044_v63 = vpack.c.bf16 %v522_v61, %v521_v60  ;;  %v4048_v2 = vpack.c.bf16 %v524_v1, %v523_v0  ;;  %v500_v3 = vld [vmem:[%s5580_s18 + $0x8] sm:$0xff]  ;;  %v526_v5 = vld [vmem:[%s5574_s24 + $0x58] sm:$0xff]  ;;  %v501_v6 = vld [vmem:[%s5580_s18 + $0x10] sm:$0xff]  ;;  %p5080_p0 = pnand %p5079_p5, %p6126_p2  ;;  %p5087_p9 = por %p5086_p7, %p5085_p13 }
 0x100   : > { %3985 = vmatprep.subr.bf16.mxu0 %v3984_v16  ;;  %4013 = vmatprep.subr.bf16.mxu1 %v4012_v36  ;;  %v4052_v7 = vpack.c.bf16 %v526_v5, %v525_v4  ;;  %v502_v8 = vld [vmem:[%s5580_s18 + $0x18] sm:$0xff]  ;;  %v527_v9 = vld [vmem:[%s5574_s24 + $0x60] sm:$0xff]  ;;  %v528_v10 = vld [vmem:[%s5574_s24 + $0x68] sm:$0xff] }
 0x101   : > { %v503_v11 = vld [vmem:[%s5580_s18 + $0x20] sm:$0xff]  ;;  %v4056_v12 = vpack.c.bf16 %v528_v10, %v527_v9  ;;  %v504_v13 = vld [vmem:[%s5580_s18 + $0x28] sm:$0xff]  ;;  %v529_v14 = vld [vmem:[%s5574_s24 + $0x70] sm:$0xff]  ;;  %p5081_p11 = pneg %p5080_p0 }
 0x102   : > { %v530_v15 = vld [vmem:[%s5574_s24 + $0x78] sm:$0xff]  ;;  %v507_v19 = vld [vmem:[%s5580_s18 + $0x40] sm:$0xff]  ;;  %v508_v20 = vld [vmem:[%s5580_s18 + $0x48] sm:$0xff] }
 0x103   : > { %3987 = vmatpush3.bf16.msra.mxu0 %v3984_v16  ;;  %4015 = vmatpush3.bf16.msra.mxu1 %v4012_v36  ;;  %v505_v16 = vld [vmem:[%s5580_s18 + $0x30] sm:$0xff]  ;;  %v4060_v17 = vpack.c.bf16 %v530_v15, %v529_v14  ;;  %v506_v18 = vld [vmem:[%s5580_s18 + $0x38] sm:$0xff]  ;;  %v784_v22 = vld [vmem:[#allocation10 + $0x8] sm:$0xff]  ;;  %p5088_p12 = pnand %p5087_p9, %p5081_p11 }
 0x104   : > { %3989 = vmatprep.subr.bf16.mxu0 %v3988_v26  ;;  %4017 = vmatprep.subr.bf16.mxu1 %v4016_v42  ;;  %v509_v21 = vld [vmem:[%s5580_s18 + $0x50] sm:$0xff]  ;;  %v510_v24 = vld [vmem:[%s5580_s18 + $0x58] sm:$0xff]  ;;  %v511_v25 = vld [vmem:[%s5580_s18 + $0x60] sm:$0xff] }
 0x105   : > { %v785_v23 = vld [vmem:[#allocation10 + $0x10] sm:$0xff]  ;;  %v512_v27 = vld [vmem:[%s5580_s18 + $0x68] sm:$0xff]  ;;  %v514_v29 = vld [vmem:[%s5580_s18 + $0x78] sm:$0xff] }
 0x106   : > { %v513_v28 = vld [vmem:[%s5580_s18 + $0x70] sm:$0xff]  ;;  %v788_v9 = vld [vmem:[#allocation10 + $0x28] sm:$0xff] }
 0x107   : > { %3991 = vmatpush3.bf16.msra.mxu0 %v3988_v26  ;;  %4019 = vmatpush3.bf16.msra.mxu1 %v4016_v42  ;;  %v786_v26 = vld [vmem:[#allocation10 + $0x18] sm:$0xff]  ;;  %v789_v10 = vld [vmem:[#allocation10 + $0x30] sm:$0xff] }
 0x108   : > { %3993 = vmatprep.subr.bf16.mxu0 %v3992_v33  ;;  %4021 = vmatprep.subr.bf16.mxu1 %v4020_v48 }
 0x10b   : > { %3995 = vmatpush3.bf16.msra.mxu0 %v3992_v33  ;;  %4023 = vmatpush3.bf16.msra.mxu1 %v4020_v48 }
 0x10c   : > { %3997 = vmatprep.subr.bf16.mxu0 %v3996_v39  ;;  %4025 = vmatprep.subr.bf16.mxu1 %v4024_v56 }
 0x10f   : > { %3999 = vmatpush3.bf16.msra.mxu0 %v3996_v39  ;;  %4027 = vmatpush3.bf16.msra.mxu1 %v4024_v56 }
 0x110   : > { %4033 = vmatprep.subr.bf16.mxu0 %v4032_v45  ;;  %4029 = vmatprep.subr.bf16.mxu1 %v4028_v62 }
 0x112   : > { %3483 = vmatmul.mubr.f32.vlgmr.msra.gmra.mrb[0].mxu0 %v498_v51 }
 0x113   : > { %4035 = vmatpush3.bf16.msra.mxu0 %v4032_v45  ;;  %3573 = vmatprep.mubr.f32.mxu0 %v783_v53 }
 0x114   : > { %4037 = vmatprep.subr.bf16.mxu0 %v4036_v52  ;;  %4031 = vmatpush3.bf16.msra.mxu1 %v4028_v62 }
 0x117   : > { %4039 = vmatpush3.bf16.msra.mxu0 %v4036_v52  ;;  %3518 = vmatmul.mubr.f32.vlgmr.msra.gmra.mrb[0].mxu1 %v500_v3 }
 0x118   : > { %4041 = vmatprep.subr.bf16.mxu0 %v4040_v59  ;;  %3520 = vmatprep.mubr.f32.mxu1 %v501_v6 }
 0x11b   : > { %4043 = vmatpush3.bf16.msra.mxu0 %v4040_v59  ;;  %3521 = vmatmul.mubr.f32.gmra.mrb[2].mxu1 %v502_v8  ;;  %v787_v8 = vld [vmem:[#allocation10 + $0x20] sm:$0xff] }
 0x11c   : > { %4045 = vmatprep.subr.bf16.mxu0 %v4044_v63  ;;  %3523 = vmatprep.mubr.f32.mxu1 %v503_v11  ;;  %v790_v11 = vld [vmem:[#allocation10 + $0x38] sm:$0xff] }
 0x11f   : > { %4047 = vmatpush3.bf16.msra.mxu0 %v4044_v63  ;;  %3524 = vmatmul.mubr.f32.gmra.mrb[4].mxu1 %v504_v13 }
 0x120   : > { %4049 = vmatprep.subr.bf16.mxu0 %v4048_v2  ;;  %3526 = vmatprep.mubr.f32.mxu1 %v505_v16 }
 0x123   : > { %4051 = vmatpush3.bf16.msra.mxu0 %v4048_v2  ;;  %3527 = vmatmul.mubr.f32.gmra.mrb[6].mxu1 %v506_v18 }
 0x124   : > { %4053 = vmatprep.subr.bf16.mxu0 %v4052_v7  ;;  %3529 = vmatprep.mubr.f32.mxu1 %v507_v19 }
 0x127   : > { %4055 = vmatpush3.bf16.msra.mxu0 %v4052_v7  ;;  %3530 = vmatmul.mubr.f32.gmra.mrb[8].mxu1 %v508_v20 }
 0x128   : > { %4057 = vmatprep.subr.bf16.mxu0 %v4056_v12  ;;  %3532 = vmatprep.mubr.f32.mxu1 %v509_v21 }
 0x12b   : > { %4059 = vmatpush3.bf16.msra.mxu0 %v4056_v12  ;;  %3533 = vmatmul.mubr.f32.gmra.mrb[10].mxu1 %v510_v24 }
 0x12c   : > { %4061 = vmatprep.subr.bf16.mxu0 %v4060_v17  ;;  %3535 = vmatprep.mubr.f32.mxu1 %v511_v25 }
 0x12f   : > { %4063 = vmatpush3.bf16.msra.mxu0 %v4060_v17  ;;  %3536 = vmatmul.mubr.f32.gmra.mrb[12].mxu1 %v512_v27 }
 0x130   : > { %3538 = vmatprep.mubr.f32.mxu1 %v513_v28 }
 0x132   : > { %3574 = vmatmul.mubr.f32.vlgmr.msra.gmra.mrb[2].mxu0 %v784_v22 }
 0x133   : > { %3576 = vmatprep.mubr.f32.mxu0 %v785_v23  ;;  %3539 = vmatmul.mubr.f32.gmra.mrb[14].mxu1 %v514_v29 }
 0x136   : > { %3577 = vmatmul.mubr.f32.gmra.mrb[4].mxu0 %v786_v26 }
 0x137   : > { %3579 = vmatprep.mubr.f32.mxu0 %v787_v8 }
 0x13a   : > { %3580 = vmatmul.mubr.f32.gmra.mrb[6].mxu0 %v788_v9 }
 0x13b   : > { %3582 = vmatprep.mubr.f32.mxu0 %v789_v10 }
 0x13e   : > { %3583 = vmatmul.mubr.f32.gmra.mrb[8].mxu0 %v790_v11 }
 0x1e5   : > { %v5626_v30 = vpop.f32.mrb[0].mxu0 }
 0x1e6   : > { %v5628_v31 = vpop.f32.mrb[1].mxu0 }
 0x1e7   : > { %1136 = vrot.lane.b32.xlu0 %v5628_v31, %s5199_s15  ;;  %3601 = vmatprep.mubr.msk.f32.mxu1 %vm961_vm0, %v5628_v31 }
 0x1ea   : > { %v3519_v32 = vpop.f32.mrb[0].mxu1 }
 0x1eb   : > { %1138 = vrot.lane.b32.xlu0 %v5626_v30, %s5199_s15  ;;  %v704_v33 = vpop.f32.mrb[1].mxu1 }
 0x1ec   : > { %v4068_v56 = vpack.c.bf16 %v3519_v32, %v704_v33  ;;  %v5642_v57 = vpack.i.bf16 %v3519_v32, %v704_v33 }
 0x1ee   : > { %v5636_v34 = vpop.f32.mrb[2].mxu1  ;;  %4069 = vmatprep.subr.bf16.mxu0 %v4068_v56 }
 0x1ef   : > { %v714_v35 = vpop.f32.mrb[3].mxu1  ;;  %4498 = vrot.lane.b32.xlu0 %v5642_v57, %s5199_s15  ;;  %4071 = vmatpush3.bf16.msra.mxu0 %v4068_v56 }
 0x1f0   : > { %v4072_v58 = vpack.c.bf16 %v5636_v34, %v714_v35  ;;  %v5664_v5 = vpack.i.bf16 %v5636_v34, %v714_v35 }
 0x1f2   : > { %v3525_v36 = vpop.f32.mrb[4].mxu1  ;;  %4073 = vmatprep.subr.bf16.mxu0 %v4072_v58 }
 0x1f3   : > { %v724_v37 = vpop.f32.mrb[5].mxu1  ;;  %4075 = vmatpush3.bf16.msra.mxu0 %v4072_v58 }
 0x1f4   : > { %v4076_v59 = vpack.c.bf16 %v3525_v36, %v724_v37  ;;  %v5645_v60 = vpack.i.bf16 %v3525_v36, %v724_v37 }
 0x1f6   : > { %v3528_v38 = vpop.f32.mrb[6].mxu1  ;;  %4508 = vrot.lane.b32.xlu0 %v5645_v60, %s5199_s15  ;;  %4077 = vmatprep.subr.bf16.mxu0 %v4076_v59 }
 0x1f7   : > { %v734_v39 = vpop.f32.mrb[7].mxu1  ;;  %4079 = vmatpush3.bf16.msra.mxu0 %v4076_v59 }
 0x1f8   : > { %v4080_v61 = vpack.c.bf16 %v3528_v38, %v734_v39  ;;  %v5666_v6 = vpack.i.bf16 %v3528_v38, %v734_v39 }
 0x1fa   : > { %v3531_v40 = vpop.f32.mrb[8].mxu1  ;;  %4081 = vmatprep.subr.bf16.mxu0 %v4080_v61 }
 0x1fb   : > { %v744_v41 = vpop.f32.mrb[9].mxu1  ;;  %4083 = vmatpush3.bf16.msra.mxu0 %v4080_v61 }
 0x1fc   : > { %v4084_v62 = vpack.c.bf16 %v3531_v40, %v744_v41  ;;  %v5647_v63 = vpack.i.bf16 %v3531_v40, %v744_v41 }
 0x1fe   : > { %v3534_v44 = vpop.f32.mrb[10].mxu1  ;;  %4518 = vrot.lane.b32.xlu0 %v5647_v63, %s5199_s15  ;;  %4085 = vmatprep.subr.bf16.mxu0 %v4084_v62 }
 0x1ff   : > { %v754_v46 = vpop.f32.mrb[11].mxu1  ;;  %4087 = vmatpush3.bf16.msra.mxu0 %v4084_v62 }
 0x200   : > { %v4088_v0 = vpack.c.bf16 %v3534_v44, %v754_v46  ;;  %v5651_v1 = vpack.i.bf16 %v3534_v44, %v754_v46 }
 0x202   : > { %v3537_v49 = vpop.f32.mrb[12].mxu1  ;;  %4523 = vrot.lane.b32.xlu0 %v5651_v1, %s5199_s15  ;;  %4089 = vmatprep.subr.bf16.mxu0 %v4088_v0 }
 0x203   : > { %v764_v51 = vpop.f32.mrb[13].mxu1  ;;  %4091 = vmatpush3.bf16.msra.mxu0 %v4088_v0 }
 0x204   : > { %v4092_v2 = vpack.c.bf16 %v3537_v49, %v764_v51  ;;  %v5653_v3 = vpack.i.bf16 %v3537_v49, %v764_v51 }
 0x205   : > { %v3575_v42 = vpop.f32.mrb[2].mxu0 }
 0x206   : > { %v882_v43 = vpop.f32.mrb[3].mxu0  ;;  %v3540_v52 = vpop.f32.mrb[14].mxu1  ;;  %4528 = vrot.lane.b32.xlu0 %v5653_v3, %s5199_s15  ;;  %4093 = vmatprep.subr.bf16.mxu0 %v4092_v2 }
 0x207   : > { %v4064_v45 = vpack.c.bf16 %v3575_v42, %v882_v43  ;;  %v774_v53 = vpop.f32.mrb[15].mxu1  ;;  %4095 = vmatpush3.bf16.msra.mxu0 %v4092_v2 }
 0x208   : > { %v4096_v4 = vpack.c.bf16 %v3540_v52, %v774_v53  ;;  %v5668_v7 = vpack.i.bf16 %v3540_v52, %v774_v53 }
 0x209   : > { %4065 = vmatprep.subr.bf16.mxu1 %v4064_v45  ;;  %v3578_v47 = vpop.f32.mrb[4].mxu0 }
 0x20a   : > { %4067 = vmatpush3.bf16.msra.mxu1 %v4064_v45  ;;  %v892_v48 = vpop.f32.mrb[5].mxu0  ;;  %4097 = vmatprep.subr.bf16.mxu0 %v4096_v4 }
 0x20b   : > { %v4100_v50 = vpack.c.bf16 %v3578_v47, %v892_v48  ;;  %4099 = vmatpush3.bf16.msra.mxu0 %v4096_v4 }
 0x20d   : > { %3602 = vmatmul.mubr.msk.f32.vlgmr.msra.gmra.mrb[16].mxu1 %vm961_vm0, %v5626_v30  ;;  %4101 = vmatprep.subr.bf16.mxu1 %v4100_v50  ;;  %v3581_v56 = vpop.f32.mrb[6].mxu0 }
 0x20e   : > { %4103 = vmatpush3.bf16.msra.mxu1 %v4100_v50  ;;  %v902_v58 = vpop.f32.mrb[7].mxu0 }
 0x20f   : > { %v4136_v59 = vpack.c.bf16 %v3581_v56, %v902_v58 }
 0x211   : > { %v3584_v61 = vpop.f32.mrb[8].mxu0 }
 0x212   : > { %v912_v62 = vpop.f32.mrb[9].mxu0 }
 0x213   : > { %v4172_v0 = vpack.c.bf16 %v3584_v61, %v912_v62 }
 0x259   : > { %v1137_v54 = vpop.permute.xlu0 %1136 }
 0x25a   : > { %3643 = vmatprep.mubr.msk.f32.mxu1 %vm961_vm0, %v1137_v54 }
 0x25d   : > { %v1139_v55 = vpop.permute.xlu0 %1138 }
 0x25e   : > { %3644 = vmatmul.mubr.msk.f32.vlgmr.msra.gmra.mrb[18].mxu1 %vm961_vm0, %v1139_v55 }
 0x261   : > { %v4499_v12 = vpop.permute.xlu0 %4498 }
 0x262   : > { %v4501_v13 = vunpack.i.h.bf16 %v4499_v12  ;;  %v4500_v14 = vunpack.i.l.bf16 %v4499_v12 }
 0x264   : > { %v4104_v15 = vpack.c.bf16 %v4501_v13, %v4500_v14 }
 0x266   : > { %4105 = vmatprep.subr.bf16.mxu1 %v4104_v15 }
 0x267   : > { %4107 = vmatpush3.bf16.msra.mxu1 %v4104_v15 }
 0x268   : > { %v4509_v26 = vpop.permute.xlu0 %4508 }
 0x269   : > { %v4511_v29 = vunpack.i.h.bf16 %v4509_v26  ;;  %v4510_v33 = vunpack.i.l.bf16 %v4509_v26  ;;  %v793_v26 = vld [vmem:[#allocation10 + $0x50] sm:$0xff] }
 0x26b   : > { %v4112_v41 = vpack.c.bf16 %v4511_v29, %v4510_v33 }
 0x270   : > { %v4519_v36 = vpop.permute.xlu0 %4518 }
 0x271   : > { %v4521_v44 = vunpack.i.h.bf16 %v4519_v36  ;;  %v4520_v45 = vunpack.i.l.bf16 %v4519_v36 }
 0x273   : > { %v4120_v50 = vpack.c.bf16 %v4521_v44, %v4520_v45 }
 0x274   : > { %v4524_v43 = vpop.permute.xlu0 %4523 }
 0x275   : > { %v4526_v48 = vunpack.i.h.bf16 %v4524_v43  ;;  %v4525_v49 = vunpack.i.l.bf16 %v4524_v43 }
 0x277   : > { %v4124_v54 = vpack.c.bf16 %v4526_v48, %v4525_v49 }
 0x278   : > { %v4529_v51 = vpop.permute.xlu0 %4528 }
 0x279   : > { %v4531_v52 = vunpack.i.h.bf16 %v4529_v51  ;;  %v4530_v53 = vunpack.i.l.bf16 %v4529_v51 }
 0x27b   : > { %v4128_v55 = vpack.c.bf16 %v4531_v52, %v4530_v53 }
 0x2e0   : > { %v5670_v16 = vpop.f32.mrb[16].mxu1 }
 0x2e1   : > { %v5672_v17 = vpop.f32.mrb[17].mxu1 }
 0x331   : > { %v3645_v18 = vpop.f32.mrb[18].mxu1 }
 0x332   : > { %v5675_v19 = vadd.f32 %v3645_v18, %v5670_v16  ;;  %v1210_v20 = vpop.f32.mrb[19].mxu1 }
 0x333   : > { %v5678_v21 = vadd.f32 %v1210_v20, %v5672_v17  ;;  %1221 = vmax.xlane.f32.xlu1 %v1210_v20 }
 0x337   : > { %1223 = vmax.xlane.f32.xlu1 %v3645_v18 }
 0x348   : > { %4503 = vrot.lane.b32.xlu1 %v5664_v5, %s5199_s15 }
 0x34c   : > { %4513 = vrot.lane.b32.xlu1 %v5666_v6, %s5199_s15 }
 0x3c0   : > { %v1222_v22 = vpop.xlane.xlu1 %1221 }
 0x3c1   : > { %v1225_v23 = vsub.f32 %v1210_v20, %v1222_v22 }
 0x3c3   : > { %v1227_v24 = vmul.f32 1.442695, %v1225_v23 }
 0x3c4   : > { %v1224_v25 = vpop.xlane.xlu1 %1223 }
 0x3c5   : > { %4812 = vpow2.f32 %v1227_v24  ;;  %v1226_v27 = vsub.f32 %v3645_v18, %v1224_v25  ;;  %v791_v24 = vld [vmem:[#allocation10 + $0x40] sm:$0xff]  ;;  %v792_v25 = vld [vmem:[#allocation10 + $0x48] sm:$0xff] }
 0x3c6   : > { %3585 = vmatprep.mubr.f32.mxu0 %v791_v24 }
 0x3c7   : > { %v1229_v28 = vmul.f32 1.442695, %v1226_v27  ;;  %3586 = vmatmul.mubr.f32.gmra.mrb[10].mxu0 %v792_v25  ;;  %v794_v27 = vld [vmem:[#allocation10 + $0x58] sm:$0xff] }
 0x3c8   : > { %v4504_v32 = vpop.permute.xlu1 %4503  ;;  %3588 = vmatprep.mubr.f32.mxu0 %v793_v26 }
 0x3c9   : > { %4814 = vpow2.f32 %v1229_v28  ;;  %v4506_v34 = vunpack.i.h.bf16 %v4504_v32  ;;  %v4505_v35 = vunpack.i.l.bf16 %v4504_v32 }
 0x3cb   : > { %v4108_v37 = vpack.c.bf16 %v4506_v34, %v4505_v35  ;;  %3589 = vmatmul.mubr.f32.gmra.mrb[12].mxu0 %v794_v27 }
 0x3cc   : > { %v4514_v38 = vpop.permute.xlu1 %4513 }
 0x3cd   : > { %v4516_v39 = vunpack.i.h.bf16 %v4514_v38  ;;  %v4515_v40 = vunpack.i.l.bf16 %v4514_v38  ;;  %4109 = vmatprep.subr.bf16.mxu1 %v4108_v37 }
 0x3ce   : > { %4111 = vmatpush3.bf16.msra.mxu1 %v4108_v37 }
 0x3cf   : > { %v4813_v42 = vpop.eup %4812  ;;  %4113 = vmatprep.subr.bf16.mxu1 %v4112_v41  ;;  %v4116_v46 = vpack.c.bf16 %v4516_v39, %v4515_v40 }
 0x3d0   : > { %1231 = vadd.xlane.f32.xlu0 %v4813_v42 }
 0x3d2   : > { %4115 = vmatpush3.bf16.msra.mxu1 %v4112_v41 }
 0x3d3   : > { %v4815_v47 = vpop.eup %4814  ;;  %4117 = vmatprep.subr.bf16.mxu1 %v4116_v46 }
 0x3d4   : > { %1233 = vadd.xlane.f32.xlu1 %v4815_v47 }
 0x3d6   : > { %4119 = vmatpush3.bf16.msra.mxu1 %v4116_v46 }
 0x3d7   : > { %4121 = vmatprep.subr.bf16.mxu1 %v4120_v50 }
 0x3da   : > { %4123 = vmatpush3.bf16.msra.mxu1 %v4120_v50 }
 0x3db   : > { %4125 = vmatprep.subr.bf16.mxu1 %v4124_v54 }
 0x3de   : > { %4127 = vmatpush3.bf16.msra.mxu1 %v4124_v54 }
 0x3df   : > { %4129 = vmatprep.subr.bf16.mxu1 %v4128_v55 }
 0x3e2   : > { %4131 = vmatpush3.bf16.msra.mxu1 %v4128_v55 }
 0x3e5   : > { %1378 = vrot.lane.b32.xlu1 %v5628_v31, %s5200_s30 }
 0x3e6   : > { %4533 = vrot.lane.b32.xlu0 %v5668_v7, %s5199_s15 }
 0x3e9   : > { %1604 = vrot.lane.b32.xlu1 %v5628_v31, %s5201_s28 }
 0x3ea   : > { %1380 = vrot.lane.b32.xlu0 %v5626_v30, %s5200_s30 }
 0x3ee   : > { %1606 = vrot.lane.b32.xlu0 %v5626_v30, %s5201_s28 }
 0x45d   : > { %v1232_v2 = vpop.xlane.xlu0 %1231 }
 0x45e   : > { %4816 = vrcp.f32 %v1232_v2 }
 0x461   : > { %v4534_v4 = vpop.permute.xlu0 %4533  ;;  %v1234_v8 = vpop.xlane.xlu1 %1233 }
 0x462   : > { %v4536_v9 = vunpack.i.h.bf16 %v4534_v4  ;;  %v4535_v10 = vunpack.i.l.bf16 %v4534_v4  ;;  %4818 = vrcp.f32 %v1234_v8 }
 0x464   : > { %v4132_v11 = vpack.c.bf16 %v4536_v9, %v4535_v10 }
 0x465   : > { %v1379_v15 = vpop.permute.xlu1 %1378  ;;  %v1381_v20 = vpop.permute.xlu0 %1380 }
 0x466   : > { %4133 = vmatprep.subr.bf16.mxu1 %v4132_v11 }
 0x467   : > { %4135 = vmatpush3.bf16.msra.mxu1 %v4132_v11 }
 0x468   : > { %v4817_v12 = vpop.eup %4816  ;;  %4137 = vmatprep.subr.bf16.mxu1 %v4136_v59 }
 0x469   : > { %v1236_v13 = vmul.f32 %v4817_v12, %v4813_v42  ;;  %v1605_v22 = vpop.permute.xlu1 %1604  ;;  %v1607_v23 = vpop.permute.xlu0 %1606 }
 0x46b   : > { %3678 = vmatprep.mubr.f32.mxu1 %v1236_v13 }
 0x46c   : > { %v4819_v14 = vpop.eup %4818 }
 0x46d   : > { %v1238_v18 = vmul.f32 %v4819_v14, %v4815_v47 }
 0x46f   : > { %3679 = vmatmul.mubr.f32.vlgmr.msra.gmra.mrb[20].mxu1 %v1238_v18 }
 0x470   : > { %4139 = vmatpush3.bf16.msra.mxu1 %v4136_v59  ;;  %3685 = vmatprep.mubr.msk.f32.mxu1 %vm961_vm0, %v1379_v15 }
 0x471   : > { %4173 = vmatprep.subr.bf16.mxu1 %v4172_v0 }
 0x473   : > { %3686 = vmatmul.mubr.msk.f32.vlgmr.msra.gmra.mrb[22].mxu1 %vm961_vm0, %v1381_v20 }
 0x474   : > { %4175 = vmatpush3.bf16.msra.mxu1 %v4172_v0  ;;  %3727 = vmatprep.mubr.msk.f32.mxu1 %vm961_vm0, %v1605_v22 }
 0x477   : > { %3728 = vmatmul.mubr.msk.f32.vlgmr.msra.gmra.mrb[24].mxu1 %vm961_vm0, %v1607_v23 }
 0x49a   : > { %v3587_v27 = vpop.f32.mrb[10].mxu0 }
 0x542   : > { %v5698_v28 = vpop.f32.mrb[20].mxu1 }
 0x543   : > { %v5700_v29 = vpop.f32.mrb[21].mxu1 }
 0x544   : > { %v4777_v32 = vpack.i.bf16 %v5698_v28, %v5700_v29 }
 0x546   : > { %v5704_v33 = vpop.f32.mrb[22].mxu1 }
 0x547   : > { %v1462_v34 = vadd.f32 %v5704_v33, %v5675_v19  ;;  %v5708_v35 = vpop.f32.mrb[23].mxu1 }
 0x548   : > { %v1461_v36 = vadd.f32 %v5708_v35, %v5678_v21 }
 0x54a   : > { %v3729_v37 = vpop.f32.mrb[24].mxu1 }
 0x54b   : > { %v5712_v38 = vadd.f32 %v3729_v37, %v1462_v34  ;;  %1691 = vmax.xlane.f32.xlu0 %v3729_v37  ;;  %v1678_v39 = vpop.f32.mrb[25].mxu1  ;;  %v922_v34 = vpop.f32.mrb[11].mxu0 }
 0x54c   : > { %v5714_v40 = vadd.f32 %v1678_v39, %v1461_v36  ;;  %1689 = vmax.xlane.f32.xlu1 %v1678_v39  ;;  %v4208_v36 = vpack.c.bf16 %v3587_v27, %v922_v34 }
 0x55d   : > { %4543 = vrot.lane.b32.xlu1 %v5664_v5, %s5201_s28 }
 0x561   : > { %4538 = vrot.lane.b32.xlu0 %v5642_v57, %s5201_s28  ;;  %4553 = vrot.lane.b32.xlu1 %v5666_v6, %s5201_s28 }
 0x565   : > { %4548 = vrot.lane.b32.xlu0 %v5645_v60, %s5201_s28  ;;  %4558 = vrot.lane.b32.xlu1 %v5647_v63, %s5201_s28 }
 0x569   : > { %4563 = vrot.lane.b32.xlu0 %v5651_v1, %s5201_s28  ;;  %4568 = vrot.lane.b32.xlu1 %v5653_v3, %s5201_s28 }
 0x56d   : > { %4573 = vrot.lane.b32.xlu0 %v5668_v7, %s5201_s28  ;;  %1830 = vrot.lane.b32.xlu1 %v5628_v31, %s5202_s8 }
 0x5d8   : > { %v1692_v19 = vpop.xlane.xlu0 %1691 }
 0x5d9   : > { %v1694_v21 = vsub.f32 %v3729_v37, %v1692_v19  ;;  %v1690_v41 = vpop.xlane.xlu1 %1689  ;;  %v3590_v37 = vpop.f32.mrb[12].mxu0 }
 0x5da   : > { %v1693_v42 = vsub.f32 %v1678_v39, %v1690_v41  ;;  %v932_v39 = vpop.f32.mrb[13].mxu0 }
 0x5db   : > { %v1697_v43 = vmul.f32 1.442695, %v1694_v21  ;;  %v4244_v19 = vpack.c.bf16 %v3590_v37, %v932_v39 }
 0x5dc   : > { %v1695_v44 = vmul.f32 1.442695, %v1693_v42  ;;  %v4539_v45 = vpop.permute.xlu0 %4538 }
 0x5dd   : > { %4820 = vpow2.f32 %v1697_v43  ;;  %v4541_v46 = vunpack.i.h.bf16 %v4539_v45  ;;  %v4540_v47 = vunpack.i.l.bf16 %v4539_v45  ;;  %v4544_v48 = vpop.permute.xlu1 %4543 }
 0x5de   : > { %4822 = vpow2.f32 %v1695_v44  ;;  %v4546_v49 = vunpack.i.h.bf16 %v4544_v48  ;;  %v4545_v50 = vunpack.i.l.bf16 %v4544_v48 }
 0x5df   : > { %v4176_v51 = vpack.c.bf16 %v4541_v46, %v4540_v47 }
 0x5e0   : > { %v4180_v52 = vpack.c.bf16 %v4546_v49, %v4545_v50  ;;  %v4549_v53 = vpop.permute.xlu0 %4548  ;;  %v795_v50 = vld [vmem:[#allocation10 + $0x60] sm:$0xff] }
 0x5e1   : > { %v4551_v54 = vunpack.i.h.bf16 %v4549_v53  ;;  %v4550_v55 = vunpack.i.l.bf16 %v4549_v53  ;;  %4177 = vmatprep.subr.bf16.mxu1 %v4176_v51  ;;  %v4554_v56 = vpop.permute.xlu1 %4553  ;;  %3591 = vmatprep.mubr.f32.mxu0 %v795_v50  ;;  %v798_v53 = vld [vmem:[#allocation10 + $0x78] sm:$0xff] }
 0x5e2   : > { %4179 = vmatpush3.bf16.msra.mxu1 %v4176_v51  ;;  %v4556_v59 = vunpack.i.h.bf16 %v4554_v56  ;;  %v4555_v61 = vunpack.i.l.bf16 %v4554_v56  ;;  %v796_v51 = vld [vmem:[#allocation10 + $0x68] sm:$0xff] }
 0x5e3   : > { %4181 = vmatprep.subr.bf16.mxu1 %v4180_v52  ;;  %v4184_v58 = vpack.c.bf16 %v4551_v54, %v4550_v55  ;;  %3592 = vmatmul.mubr.f32.gmra.mrb[14].mxu0 %v796_v51 }
 0x5e4   : > { %v4188_v4 = vpack.c.bf16 %v4556_v59, %v4555_v61  ;;  %v4564_v10 = vpop.permute.xlu0 %4563 }
 0x5e5   : > { %v4559_v62 = vpop.permute.xlu1 %4558  ;;  %v4566_v11 = vunpack.i.h.bf16 %v4564_v10  ;;  %v4565_v12 = vunpack.i.l.bf16 %v4564_v10 }
 0x5e6   : > { %4183 = vmatpush3.bf16.msra.mxu1 %v4180_v52  ;;  %v4561_v8 = vunpack.i.h.bf16 %v4559_v62  ;;  %v4560_v9 = vunpack.i.l.bf16 %v4559_v62  ;;  %v797_v52 = vld [vmem:[#allocation10 + $0x70] sm:$0xff] }
 0x5e7   : > { %v4821_v0 = vpop.eup %4820  ;;  %4185 = vmatprep.subr.bf16.mxu1 %v4184_v58  ;;  %v4196_v15 = vpack.c.bf16 %v4566_v11, %v4565_v12  ;;  %3594 = vmatprep.mubr.f32.mxu0 %v797_v52 }
 0x5e8   : > { %v4823_v2 = vpop.eup %4822  ;;  %1701 = vadd.xlane.f32.xlu0 %v4821_v0  ;;  %v4192_v13 = vpack.c.bf16 %v4561_v8, %v4560_v9  ;;  %v4574_v22 = vpop.permute.xlu0 %4573  ;;  %3595 = vmatmul.mubr.f32.gmra.mrb[16].mxu0 %v798_v53 }
 0x5e9   : > { %1699 = vadd.xlane.f32.xlu1 %v4823_v2  ;;  %v4569_v14 = vpop.permute.xlu1 %4568  ;;  %v4576_v23 = vunpack.i.h.bf16 %v4574_v22  ;;  %v4575_v24 = vunpack.i.l.bf16 %v4574_v22 }
 0x5ea   : > { %4187 = vmatpush3.bf16.msra.mxu1 %v4184_v58  ;;  %v4571_v18 = vunpack.i.h.bf16 %v4569_v14  ;;  %v4570_v20 = vunpack.i.l.bf16 %v4569_v14 }
 0x5eb   : > { %4189 = vmatprep.subr.bf16.mxu1 %v4188_v4  ;;  %v4204_v26 = vpack.c.bf16 %v4576_v23, %v4575_v24 }
 0x5ec   : > { %v4200_v25 = vpack.c.bf16 %v4571_v18, %v4570_v20 }
 0x5ed   : > { %v1831_v21 = vpop.permute.xlu1 %1830 }
 0x5ee   : > { %4191 = vmatpush3.bf16.msra.mxu1 %v4188_v4 }
 0x5ef   : > { %4193 = vmatprep.subr.bf16.mxu1 %v4192_v13 }
 0x5f2   : > { %4195 = vmatpush3.bf16.msra.mxu1 %v4192_v13 }
 0x5f3   : > { %4197 = vmatprep.subr.bf16.mxu1 %v4196_v15 }
 0x5f6   : > { %4199 = vmatpush3.bf16.msra.mxu1 %v4196_v15 }
 0x5f7   : > { %4201 = vmatprep.subr.bf16.mxu1 %v4200_v25 }
 0x5fa   : > { %2056 = vrot.lane.b32.xlu1 %v5628_v31, %s5203_s22  ;;  %4203 = vmatpush3.bf16.msra.mxu1 %v4200_v25 }
 0x5fb   : > { %4205 = vmatprep.subr.bf16.mxu1 %v4204_v26 }
 0x5fe   : > { %1832 = vrot.lane.b32.xlu0 %v5626_v30, %s5202_s8  ;;  %4207 = vmatpush3.bf16.msra.mxu1 %v4204_v26 }
 0x5ff   : > { %4209 = vmatprep.subr.bf16.mxu1 %v4208_v36 }
 0x602   : > { %2058 = vrot.lane.b32.xlu0 %v5626_v30, %s5203_s22 }
 0x675   : > { %v1702_v41 = vpop.xlane.xlu0 %1701 }
 0x676   : > { %4824 = vrcp.f32 %v1702_v41  ;;  %v1700_v42 = vpop.xlane.xlu1 %1699 }
 0x677   : > { %4826 = vrcp.f32 %v1700_v42 }
 0x679   : > { %v1833_v47 = vpop.permute.xlu0 %1832 }
 0x67a   : > { %v2057_v48 = vpop.permute.xlu1 %2056 }
 0x67d   : > { %v2059_v49 = vpop.permute.xlu0 %2058 }
 0x680   : > { %v4825_v43 = vpop.eup %4824 }
 0x681   : > { %v4827_v44 = vpop.eup %4826  ;;  %v1706_v46 = vmul.f32 %v4825_v43, %v4821_v0 }
 0x682   : > { %v1704_v45 = vmul.f32 %v4827_v44, %v4823_v2 }
 0x684   : > { %3762 = vmatprep.mubr.f32.mxu1 %v1704_v45 }
 0x685   : > { %3763 = vmatmul.mubr.f32.vlgmr.msra.gmra.mrb[26].mxu1 %v1706_v46 }
 0x686   : > { %4211 = vmatpush3.bf16.msra.mxu1 %v4208_v36  ;;  %3769 = vmatprep.mubr.msk.f32.mxu1 %vm961_vm0, %v1831_v21 }
 0x687   : > { %4245 = vmatprep.subr.bf16.mxu1 %v4244_v19 }
 0x689   : > { %3770 = vmatmul.mubr.msk.f32.vlgmr.msra.gmra.mrb[28].mxu1 %vm961_vm0, %v1833_v47 }
 0x68a   : > { %4247 = vmatpush3.bf16.msra.mxu1 %v4244_v19  ;;  %3811 = vmatprep.mubr.msk.f32.mxu1 %vm961_vm0, %v2057_v48 }
 0x68d   : > { %3812 = vmatmul.mubr.msk.f32.vlgmr.msra.gmra.mrb[30].mxu1 %vm961_vm0, %v2059_v49 }
 0x758   : > { %v5744_v54 = vpop.f32.mrb[26].mxu1 }
 0x759   : > { %v5746_v55 = vpop.f32.mrb[27].mxu1 }
 0x75a   : > { %v4787_v56 = vpack.i.bf16 %v5744_v54, %v5746_v55 }
 0x75c   : > { %v5750_v58 = vpop.f32.mrb[28].mxu1 }
 0x75d   : > { %v1914_v59 = vadd.f32 %v5750_v58, %v5712_v38  ;;  %v5754_v61 = vpop.f32.mrb[29].mxu1 }
 0x75e   : > { %v1913_v62 = vadd.f32 %v5754_v61, %v5714_v40 }
 0x760   : > { %v3813_v0 = vpop.f32.mrb[30].mxu1 }
 0x761   : > { %v5758_v2 = vadd.f32 %v3813_v0, %v1914_v59  ;;  %2143 = vmax.xlane.f32.xlu0 %v3813_v0  ;;  %v2130_v4 = vpop.f32.mrb[31].mxu1 }
 0x762   : > { %v5760_v8 = vadd.f32 %v2130_v4, %v1913_v62  ;;  %2141 = vmax.xlane.f32.xlu1 %v2130_v4 }
 0x773   : > { %4583 = vrot.lane.b32.xlu1 %v5664_v5, %s5203_s22 }
 0x777   : > { %4578 = vrot.lane.b32.xlu0 %v5642_v57, %s5203_s22  ;;  %4593 = vrot.lane.b32.xlu1 %v5666_v6, %s5203_s22 }
 0x77b   : > { %4588 = vrot.lane.b32.xlu0 %v5645_v60, %s5203_s22  ;;  %4598 = vrot.lane.b32.xlu1 %v5647_v63, %s5203_s22 }
 0x77f   : > { %4603 = vrot.lane.b32.xlu0 %v5651_v1, %s5203_s22  ;;  %4608 = vrot.lane.b32.xlu1 %v5653_v3, %s5203_s22 }
 0x783   : > { %4613 = vrot.lane.b32.xlu0 %v5668_v7, %s5203_s22  ;;  %2282 = vrot.lane.b32.xlu1 %v5628_v31, %s5204_s20 }
 0x7ee   : > { %v2144_v38 = vpop.xlane.xlu0 %2143 }
 0x7ef   : > { %v2146_v40 = vsub.f32 %v3813_v0, %v2144_v38  ;;  %v2142_v9 = vpop.xlane.xlu1 %2141  ;;  %v3593_v38 = vpop.f32.mrb[14].mxu0 }
 0x7f0   : > { %v2145_v10 = vsub.f32 %v2130_v4, %v2142_v9 }
 0x7f1   : > { %v2149_v11 = vmul.f32 1.442695, %v2146_v40  ;;  %v942_v40 = vpop.f32.mrb[15].mxu0 }
 0x7f2   : > { %v2147_v12 = vmul.f32 1.442695, %v2145_v10  ;;  %v4579_v13 = vpop.permute.xlu0 %4578  ;;  %v4280_v9 = vpack.c.bf16 %v3593_v38, %v942_v40  ;;  %v3596_v10 = vpop.f32.mrb[16].mxu0 }
 0x7f3   : > { %4828 = vpow2.f32 %v2149_v11  ;;  %v4581_v14 = vunpack.i.h.bf16 %v4579_v13  ;;  %v4580_v15 = vunpack.i.l.bf16 %v4579_v13  ;;  %v4584_v18 = vpop.permute.xlu1 %4583  ;;  %v952_v11 = vpop.f32.mrb[17].mxu0 }
 0x7f4   : > { %4830 = vpow2.f32 %v2147_v12  ;;  %v4586_v20 = vunpack.i.h.bf16 %v4584_v18  ;;  %v4585_v22 = vunpack.i.l.bf16 %v4584_v18  ;;  %v4316_v12 = vpack.c.bf16 %v3596_v10, %v952_v11 }
 0x7f5   : > { %v4248_v23 = vpack.c.bf16 %v4581_v14, %v4580_v15 }
 0x7f6   : > { %v4252_v24 = vpack.c.bf16 %v4586_v20, %v4585_v22  ;;  %v4589_v25 = vpop.permute.xlu0 %4588 }
 0x7f7   : > { %v4591_v26 = vunpack.i.h.bf16 %v4589_v25  ;;  %v4590_v27 = vunpack.i.l.bf16 %v4589_v25  ;;  %4249 = vmatprep.subr.bf16.mxu1 %v4248_v23  ;;  %v4594_v34 = vpop.permute.xlu1 %4593 }
 0x7f8   : > { %4251 = vmatpush3.bf16.msra.mxu1 %v4248_v23  ;;  %v4596_v37 = vunpack.i.h.bf16 %v4594_v34  ;;  %v4595_v39 = vunpack.i.l.bf16 %v4594_v34 }
 0x7f9   : > { %4253 = vmatprep.subr.bf16.mxu1 %v4252_v24  ;;  %v4256_v36 = vpack.c.bf16 %v4591_v26, %v4590_v27 }
 0x7fa   : > { %v4260_v42 = vpack.c.bf16 %v4596_v37, %v4595_v39  ;;  %v4604_v45 = vpop.permute.xlu0 %4603 }
 0x7fb   : > { %v4599_v19 = vpop.permute.xlu1 %4598  ;;  %v4606_v46 = vunpack.i.h.bf16 %v4604_v45  ;;  %v4605_v47 = vunpack.i.l.bf16 %v4604_v45 }
 0x7fc   : > { %4255 = vmatpush3.bf16.msra.mxu1 %v4252_v24  ;;  %v4601_v43 = vunpack.i.h.bf16 %v4599_v19  ;;  %v4600_v44 = vunpack.i.l.bf16 %v4599_v19 }
 0x7fd   : > { %v4829_v21 = vpop.eup %4828  ;;  %4257 = vmatprep.subr.bf16.mxu1 %v4256_v36  ;;  %v4268_v50 = vpack.c.bf16 %v4606_v46, %v4605_v47 }
 0x7fe   : > { %v4831_v41 = vpop.eup %4830  ;;  %2153 = vadd.xlane.f32.xlu0 %v4829_v21  ;;  %v4264_v48 = vpack.c.bf16 %v4601_v43, %v4600_v44  ;;  %v4614_v53 = vpop.permute.xlu0 %4613 }
 0x7ff   : > { %2151 = vadd.xlane.f32.xlu1 %v4831_v41  ;;  %v4609_v49 = vpop.permute.xlu1 %4608  ;;  %v4616_v59 = vunpack.i.h.bf16 %v4614_v53  ;;  %v4615_v62 = vunpack.i.l.bf16 %v4614_v53 }
 0x800   : > { %4259 = vmatpush3.bf16.msra.mxu1 %v4256_v36  ;;  %v4611_v51 = vunpack.i.h.bf16 %v4609_v49  ;;  %v4610_v52 = vunpack.i.l.bf16 %v4609_v49 }
 0x801   : > { %4261 = vmatprep.subr.bf16.mxu1 %v4260_v42  ;;  %v4276_v4 = vpack.c.bf16 %v4616_v59, %v4615_v62 }
 0x802   : > { %v4272_v0 = vpack.c.bf16 %v4611_v51, %v4610_v52 }
 0x804   : > { %4263 = vmatpush3.bf16.msra.mxu1 %v4260_v42 }
 0x805   : > { %4265 = vmatprep.subr.bf16.mxu1 %v4264_v48 }
 0x808   : > { %4267 = vmatpush3.bf16.msra.mxu1 %v4264_v48 }
 0x809   : > { %4269 = vmatprep.subr.bf16.mxu1 %v4268_v50 }
 0x80c   : > { %4271 = vmatpush3.bf16.msra.mxu1 %v4268_v50 }
 0x80d   : > { %4273 = vmatprep.subr.bf16.mxu1 %v4272_v0 }
 0x810   : > { %2508 = vrot.lane.b32.xlu1 %v5628_v31, %s5205_s3  ;;  %4275 = vmatpush3.bf16.msra.mxu1 %v4272_v0  ;;  %v2283_v31 = vpop.permute.xlu1 %2282 }
 0x811   : > { %4277 = vmatprep.subr.bf16.mxu1 %v4276_v4 }
 0x814   : > { %2284 = vrot.lane.b32.xlu0 %v5626_v30, %s5204_s20  ;;  %4279 = vmatpush3.bf16.msra.mxu1 %v4276_v4 }
 0x815   : > { %4281 = vmatprep.subr.bf16.mxu1 %v4280_v9 }
 0x818   : > { %2510 = vrot.lane.b32.xlu0 %v5626_v30, %s5205_s3 }
 0x834   : > { %1043 = vmax.xlane.f32.xlu1 %v5672_v17 }
 0x837   : > { %1045 = vmax.xlane.f32.xlu0 %v5670_v16 }
 0x838   : > { %1465 = vmax.xlane.f32.xlu1 %v5704_v33 }
 0x83b   : > { %1463 = vmax.xlane.f32.xlu0 %v5708_v35 }
 0x83c   : > { %1917 = vmax.xlane.f32.xlu1 %v5750_v58 }
 0x83f   : > { %1915 = vmax.xlane.f32.xlu0 %v5754_v61 }
 0x88b   : > { %v2154_v13 = vpop.xlane.xlu0 %2153 }
 0x88c   : > { %4832 = vrcp.f32 %v2154_v13  ;;  %v2152_v14 = vpop.xlane.xlu1 %2151 }
 0x88d   : > { %4834 = vrcp.f32 %v2152_v14 }
 0x88f   : > { %v2285_v22 = vpop.permute.xlu0 %2284 }
 0x890   : > { %v2509_v23 = vpop.permute.xlu1 %2508 }
 0x893   : > { %v2511_v24 = vpop.permute.xlu0 %2510 }
 0x896   : > { %v4833_v30 = vpop.eup %4832 }
 0x897   : > { %v4835_v15 = vpop.eup %4834  ;;  %v2158_v20 = vmul.f32 %v4833_v30, %v4829_v21 }
 0x898   : > { %v2156_v18 = vmul.f32 %v4835_v15, %v4831_v41 }
 0x89a   : > { %3846 = vmatprep.mubr.f32.mxu1 %v2156_v18 }
 0x89b   : > { %3847 = vmatmul.mubr.f32.vlgmr.msra.gmra.mrb[32].mxu1 %v2158_v20 }
 0x89c   : > { %4283 = vmatpush3.bf16.msra.mxu1 %v4280_v9  ;;  %3853 = vmatprep.mubr.msk.f32.mxu1 %vm961_vm0, %v2283_v31 }
 0x89d   : > { %4317 = vmatprep.subr.bf16.mxu1 %v4316_v12 }
 0x89f   : > { %3854 = vmatmul.mubr.msk.f32.vlgmr.msra.gmra.mrb[34].mxu1 %vm961_vm0, %v2285_v22 }
 0x8a0   : > { %4319 = vmatpush3.bf16.msra.mxu1 %v4316_v12  ;;  %3895 = vmatprep.mubr.msk.f32.mxu1 %vm961_vm0, %v2509_v23 }
 0x8a3   : > { %3896 = vmatmul.mubr.msk.f32.vlgmr.msra.gmra.mrb[36].mxu1 %vm961_vm0, %v2511_v24 }
 0x8c1   : > { %v1044_v25 = vpop.xlane.xlu1 %1043 }
 0x8c2   : > { %v1047_v26 = vsub.f32 %v5672_v17, %v1044_v25 }
 0x8c4   : > { %v1049_v27 = vmul.f32 1.442695, %v1047_v26  ;;  %v1046_v34 = vpop.xlane.xlu0 %1045 }
 0x8c5   : > { %v1048_v36 = vsub.f32 %v5670_v16, %v1046_v34  ;;  %v1466_v21 = vpop.xlane.xlu1 %1465 }
 0x8c6   : > { %4836 = vpow2.f32 %v1049_v27  ;;  %v1468_v17 = vsub.f32 %v5704_v33, %v1466_v21 }
 0x8c7   : > { %v1051_v37 = vmul.f32 1.442695, %v1048_v36 }
 0x8c8   : > { %v1464_v41 = vpop.xlane.xlu0 %1463  ;;  %v1471_v16 = vmul.f32 1.442695, %v1468_v17 }
 0x8c9   : > { %4838 = vpow2.f32 %v1051_v37  ;;  %v1467_v42 = vsub.f32 %v5708_v35, %v1464_v41  ;;  %v1918_v33 = vpop.xlane.xlu1 %1917 }
 0x8ca   : > { %4840 = vpow2.f32 %v1471_v16  ;;  %v1920_v35 = vsub.f32 %v5750_v58, %v1918_v33 }
 0x8cb   : > { %v1469_v43 = vmul.f32 1.442695, %v1467_v42 }
 0x8cc   : > { %v1916_v46 = vpop.xlane.xlu0 %1915  ;;  %v1923_v48 = vmul.f32 1.442695, %v1920_v35 }
 0x8cd   : > { %4842 = vpow2.f32 %v1469_v43  ;;  %v1919_v47 = vsub.f32 %v5754_v61, %v1916_v46 }
 0x8ce   : > { %4844 = vpow2.f32 %v1923_v48 }
 0x8cf   : > { %v1921_v49 = vmul.f32 1.442695, %v1919_v47 }
 0x8d0   : > { %v4837_v39 = vpop.eup %4836 }
 0x8d1   : > { %1053 = vadd.xlane.f32.xlu0 %v4837_v39  ;;  %4846 = vpow2.f32 %v1921_v49 }
 0x8d3   : > { %v4839_v19 = vpop.eup %4838 }
 0x8d4   : > { %1055 = vadd.xlane.f32.xlu1 %v4839_v19  ;;  %v5804_v44 = vpop.eup %4840 }
 0x8d7   : > { %v5807_v45 = vpop.eup %4842 }
 0x8d8   : > { %v5828_v50 = vpop.eup %4844 }
 0x8db   : > { %v5831_v51 = vpop.eup %4846 }
 0x8e5   : > { %4623 = vrot.lane.b32.xlu1 %v5664_v5, %s5200_s30 }
 0x8e7   : > { %4618 = vrot.lane.b32.xlu0 %v5642_v57, %s5200_s30 }
 0x906   : > { %1475 = vadd.xlane.f32.xlu0 %v5804_v44 }
 0x909   : > { %1473 = vadd.xlane.f32.xlu1 %v5807_v45 }
 0x91a   : > { %4633 = vrot.lane.b32.xlu1 %v5666_v6, %s5200_s30 }
 0x91c   : > { %4628 = vrot.lane.b32.xlu0 %v5645_v60, %s5200_s30 }
 0x91e   : > { %4638 = vrot.lane.b32.xlu1 %v5647_v63, %s5200_s30 }
 0x920   : > { %4643 = vrot.lane.b32.xlu0 %v5651_v1, %s5200_s30 }
 0x922   : > { %4648 = vrot.lane.b32.xlu1 %v5653_v3, %s5200_s30 }
 0x924   : > { %4653 = vrot.lane.b32.xlu0 %v5668_v7, %s5200_s30 }
 0x926   : > { %4658 = vrot.lane.b32.xlu1 %v5642_v57, %s5202_s8 }
 0x928   : > { %4663 = vrot.lane.b32.xlu0 %v5664_v5, %s5202_s8 }
 0x947   : > { %1927 = vadd.xlane.f32.xlu0 %v5828_v50 }
 0x94a   : > { %1925 = vadd.xlane.f32.xlu1 %v5831_v51 }
 0x95b   : > { %4673 = vrot.lane.b32.xlu1 %v5666_v6, %s5202_s8 }
 0x95d   : > { %4668 = vrot.lane.b32.xlu0 %v5645_v60, %s5202_s8 }
 0x95e   : > { %v1054_v58 = vpop.xlane.xlu0 %1053 }
 0x95f   : > { %4848 = vrcp.f32 %v1054_v58  ;;  %4678 = vrot.lane.b32.xlu1 %v5647_v63, %s5202_s8 }
 0x961   : > { %4683 = vrot.lane.b32.xlu0 %v5651_v1, %s5202_s8  ;;  %v1056_v61 = vpop.xlane.xlu1 %1055 }
 0x962   : > { %4850 = vrcp.f32 %v1056_v61  ;;  %v4619_v52 = vpop.permute.xlu0 %4618 }
 0x963   : > { %v4621_v53 = vunpack.i.h.bf16 %v4619_v52  ;;  %v4620_v59 = vunpack.i.l.bf16 %v4619_v52  ;;  %4688 = vrot.lane.b32.xlu1 %v5653_v3, %s5202_s8 }
 0x965   : > { %v4140_v62 = vpack.c.bf16 %v4621_v53, %v4620_v59  ;;  %4693 = vrot.lane.b32.xlu0 %v5668_v7, %s5202_s8  ;;  %v4624_v0 = vpop.permute.xlu1 %4623 }
 0x966   : > { %v4626_v40 = vunpack.i.h.bf16 %v4624_v0  ;;  %v4625_v9 = vunpack.i.l.bf16 %v4624_v0 }
 0x967   : > { %4698 = vrot.lane.b32.xlu1 %v5642_v57, %s5204_s20  ;;  %4141 = vmatprep.subr.bf16.mxu0 %v4140_v62 }
 0x968   : > { %v4144_v31 = vpack.c.bf16 %v4626_v40, %v4625_v9 }
 0x969   : > { %v4849_v4 = vpop.eup %4848 }
 0x96a   : > { %v1058_v38 = vmul.f32 %v4849_v4, %v4837_v39 }
 0x96c   : > { %v4851_v10 = vpop.eup %4850  ;;  %3636 = vmatprep.mubr.f32.mxu0 %v1058_v38 }
 0x96d   : > { %v1060_v11 = vmul.f32 %v4851_v10, %v4839_v19 }
 0x96e   : > { %v5848_v12 = vpop.f32.mrb[32].mxu1 }
 0x96f   : > { %3637 = vmatmul.mubr.f32.vlgmr.msra.gmra.mrb[18].mxu0 %v1060_v11  ;;  %v5850_v13 = vpop.f32.mrb[33].mxu1 }
 0x970   : > { %4143 = vmatpush3.bf16.msra.mxu0 %v4140_v62  ;;  %v4797_v14 = vpack.i.bf16 %v5848_v12, %v5850_v13 }
 0x971   : > { %4145 = vmatprep.subr.bf16.mxu0 %v4144_v31 }
 0x972   : > { %v5854_v30 = vpop.f32.mrb[34].mxu1 }
 0x973   : > { %v2366_v15 = vadd.f32 %v5854_v30, %v5758_v2  ;;  %v5858_v18 = vpop.f32.mrb[35].mxu1 }
 0x974   : > { %4147 = vmatpush3.bf16.msra.mxu0 %v4144_v31  ;;  %v2365_v20 = vadd.f32 %v5858_v18, %v5760_v8 }
 0x976   : > { %v5862_v22 = vpop.f32.mrb[36].mxu1 }
 0x977   : > { %v2592_v23 = vadd.f32 %v5862_v22, %v2366_v15  ;;  %v5865_v24 = vpop.f32.mrb[37].mxu1 }
 0x978   : > { %v2591_v25 = vadd.f32 %v5865_v24, %v2365_v20 }
 0x979   : > { %v2735_v26 = vmul.f32 0.125, %v2592_v23 }
 0x97a   : > { %v2734_v27 = vmul.f32 0.125, %v2591_v25 }
 0x97b   : > { %2737 = vst [vmem:[%s5869_s9 + $0x8] sm:$0xff] %v2735_v26 }
 0x97c   : > { %2736 = vst [vmem:[%s5869_s9] sm:$0xff] %v2734_v27 }
 0x984   : > { %2367 = vmax.xlane.f32.xlu0 %v5858_v18 }
 0x988   : > { %2593 = vmax.xlane.f32.xlu0 %v5865_v24 }
 0x98b   : > { %2369 = vmax.xlane.f32.xlu1 %v5854_v30 }
 0x98f   : > { %2595 = vmax.xlane.f32.xlu1 %v5862_v22 }
 0x993   : > { %v1476_v2 = vpop.xlane.xlu0 %1475 }
 0x996   : > { %v1474_v8 = vpop.xlane.xlu1 %1473 }
 0x997   : > { %4852 = vrcp.f32 %v1474_v8  ;;  %v4629_v34 = vpop.permute.xlu0 %4628 }
 0x998   : > { %v4631_v36 = vunpack.i.h.bf16 %v4629_v34  ;;  %v4630_v37 = vunpack.i.l.bf16 %v4629_v34  ;;  %4854 = vrcp.f32 %v1476_v2 }
 0x99a   : > { %v4148_v39 = vpack.c.bf16 %v4631_v36, %v4630_v37  ;;  %v4634_v19 = vpop.permute.xlu1 %4633 }
 0x99b   : > { %v4636_v21 = vunpack.i.h.bf16 %v4634_v19  ;;  %v4635_v17 = vunpack.i.l.bf16 %v4634_v19  ;;  %v4644_v42 = vpop.permute.xlu0 %4643 }
 0x99c   : > { %4149 = vmatprep.subr.bf16.mxu0 %v4148_v39  ;;  %v4646_v35 = vunpack.i.h.bf16 %v4644_v42  ;;  %v4645_v46 = vunpack.i.l.bf16 %v4644_v42 }
 0x99d   : > { %v4152_v41 = vpack.c.bf16 %v4636_v21, %v4635_v17  ;;  %4151 = vmatpush3.bf16.msra.mxu0 %v4148_v39 }
 0x99e   : > { %v4639_v16 = vpop.permute.xlu1 %4638  ;;  %4703 = vrot.lane.b32.xlu0 %v5642_v57, %s5205_s3  ;;  %v4160_v61 = vpack.c.bf16 %v4646_v35, %v4645_v46 }
 0x99f   : > { %v4641_v43 = vunpack.i.h.bf16 %v4639_v16  ;;  %v4640_v33 = vunpack.i.l.bf16 %v4639_v16  ;;  %4153 = vmatprep.subr.bf16.mxu0 %v4152_v41  ;;  %v4654_v53 = vpop.permute.xlu0 %4653 }
 0x9a0   : > { %4708 = vrot.lane.b32.xlu1 %v5664_v5, %s5204_s20  ;;  %v4656_v59 = vunpack.i.h.bf16 %v4654_v53  ;;  %v4655_v62 = vunpack.i.l.bf16 %v4654_v53 }
 0x9a1   : > { %v4853_v47 = vpop.eup %4852  ;;  %v4156_v48 = vpack.c.bf16 %v4641_v43, %v4640_v33  ;;  %4155 = vmatpush3.bf16.msra.mxu0 %v4152_v41 }
 0x9a2   : > { %v4649_v49 = vpop.permute.xlu1 %4648  ;;  %4713 = vrot.lane.b32.xlu0 %v5664_v5, %s5205_s3  ;;  %v1478_v58 = vmul.f32 %v4853_v47, %v5807_v45  ;;  %v4168_v0 = vpack.c.bf16 %v4656_v59, %v4655_v62 }
 0x9a3   : > { %4157 = vmatprep.subr.bf16.mxu0 %v4156_v48  ;;  %v4651_v57 = vunpack.i.h.bf16 %v4649_v49  ;;  %v4650_v52 = vunpack.i.l.bf16 %v4649_v49  ;;  %v4664_v40 = vpop.permute.xlu0 %4663 }
 0x9a4   : > { %3720 = vmatprep.mubr.f32.mxu0 %v1478_v58  ;;  %4718 = vrot.lane.b32.xlu1 %v5645_v60, %s5204_s20  ;;  %v4666_v9 = vunpack.i.h.bf16 %v4664_v40  ;;  %v4665_v10 = vunpack.i.l.bf16 %v4664_v40 }
 0x9a5   : > { %4159 = vmatpush3.bf16.msra.mxu0 %v4156_v48  ;;  %v4164_v5 = vpack.c.bf16 %v4651_v57, %v4650_v52 }
 0x9a6   : > { %4161 = vmatprep.subr.bf16.mxu0 %v4160_v61  ;;  %4723 = vrot.lane.b32.xlu0 %v5645_v60, %s5205_s3  ;;  %v4659_v45 = vpop.permute.xlu1 %4658  ;;  %v4855_v60 = vpop.eup %4854  ;;  %v4216_v31 = vpack.c.bf16 %v4666_v9, %v4665_v10 }
 0x9a7   : > { %v4661_v4 = vunpack.i.h.bf16 %v4659_v45  ;;  %v4660_v38 = vunpack.i.l.bf16 %v4659_v45 }
 0x9a8   : > { %4728 = vrot.lane.b32.xlu1 %v5666_v6, %s5204_s20 }
 0x9a9   : > { %4163 = vmatpush3.bf16.msra.mxu0 %v4160_v61  ;;  %v4212_v11 = vpack.c.bf16 %v4661_v4, %v4660_v38 }
 0x9aa   : > { %4165 = vmatprep.subr.bf16.mxu0 %v4164_v5  ;;  %4743 = vrot.lane.b32.xlu0 %v5647_v63, %s5205_s3 }
 0x9ac   : > { %4733 = vrot.lane.b32.xlu1 %v5666_v6, %s5205_s3  ;;  %v1480_v6 = vmul.f32 %v4855_v60, %v5804_v44 }
 0x9ad   : > { %4167 = vmatpush3.bf16.msra.mxu0 %v4164_v5 }
 0x9ae   : > { %4169 = vmatprep.subr.bf16.mxu0 %v4168_v0  ;;  %4753 = vrot.lane.b32.xlu0 %v5651_v1, %s5205_s3 }
 0x9b0   : > { %4738 = vrot.lane.b32.xlu1 %v5647_v63, %s5204_s20 }
 0x9b1   : > { %4171 = vmatpush3.bf16.msra.mxu0 %v4168_v0 }
 0x9b2   : > { %4213 = vmatprep.subr.bf16.mxu0 %v4212_v11  ;;  %4763 = vrot.lane.b32.xlu0 %v5653_v3, %s5205_s3 }
 0x9b4   : > { %3721 = vmatmul.mubr.f32.vlgmr.msra.gmra.mrb[20].mxu0 %v1480_v6  ;;  %4748 = vrot.lane.b32.xlu1 %v5651_v1, %s5204_s20 }
 0x9b5   : > { %4215 = vmatpush3.bf16.msra.mxu0 %v4212_v11 }
 0x9b6   : > { %4217 = vmatprep.subr.bf16.mxu0 %v4216_v31 }
 0x9b8   : > { %4758 = vrot.lane.b32.xlu1 %v5653_v3, %s5204_s20 }
 0x9b9   : > { %4219 = vmatpush3.bf16.msra.mxu0 %v4216_v31 }
 0x9d4   : > { %v1928_v15 = vpop.xlane.xlu0 %1927 }
 0x9d7   : > { %v1926_v63 = vpop.xlane.xlu1 %1925 }
 0x9d8   : > { %4856 = vrcp.f32 %v1926_v63  ;;  %v4669_v20 = vpop.permute.xlu0 %4668 }
 0x9d9   : > { %v4671_v23 = vunpack.i.h.bf16 %v4669_v20  ;;  %v4670_v25 = vunpack.i.l.bf16 %v4669_v20  ;;  %4858 = vrcp.f32 %v1928_v15 }
 0x9db   : > { %v4220_v26 = vpack.c.bf16 %v4671_v23, %v4670_v25  ;;  %v4674_v27 = vpop.permute.xlu1 %4673 }
 0x9dc   : > { %v4676_v44 = vunpack.i.h.bf16 %v4674_v27  ;;  %v4675_v2 = vunpack.i.l.bf16 %v4674_v27  ;;  %v4684_v34 = vpop.permute.xlu0 %4683 }
 0x9dd   : > { %4221 = vmatprep.subr.bf16.mxu0 %v4220_v26  ;;  %v4686_v3 = vunpack.i.h.bf16 %v4684_v34  ;;  %v4685_v39 = vunpack.i.l.bf16 %v4684_v34 }
 0x9de   : > { %v4224_v8 = vpack.c.bf16 %v4676_v44, %v4675_v2  ;;  %4223 = vmatpush3.bf16.msra.mxu0 %v4220_v26 }
 0x9df   : > { %v4679_v1 = vpop.permute.xlu1 %4678  ;;  %v4232_v42 = vpack.c.bf16 %v4686_v3, %v4685_v39 }
 0x9e0   : > { %v4681_v36 = vunpack.i.h.bf16 %v4679_v1  ;;  %v4680_v37 = vunpack.i.l.bf16 %v4679_v1  ;;  %4225 = vmatprep.subr.bf16.mxu0 %v4224_v8  ;;  %v4694_v33 = vpop.permute.xlu0 %4693 }
 0x9e1   : > { %v4696_v35 = vunpack.i.h.bf16 %v4694_v33  ;;  %v4695_v46 = vunpack.i.l.bf16 %v4694_v33 }
 0x9e2   : > { %v4857_v19 = vpop.eup %4856  ;;  %v4228_v21 = vpack.c.bf16 %v4681_v36, %v4680_v37  ;;  %4227 = vmatpush3.bf16.msra.mxu0 %v4224_v8 }
 0x9e3   : > { %v4689_v17 = vpop.permute.xlu1 %4688  ;;  %v1930_v41 = vmul.f32 %v4857_v19, %v5831_v51  ;;  %v4240_v49 = vpack.c.bf16 %v4696_v35, %v4695_v46  ;;  %v4859_v51 = vpop.eup %4858 }
 0x9e4   : > { %4229 = vmatprep.subr.bf16.mxu0 %v4228_v21  ;;  %v4691_v16 = vunpack.i.h.bf16 %v4689_v17  ;;  %v4690_v43 = vunpack.i.l.bf16 %v4689_v17  ;;  %v1932_v52 = vmul.f32 %v4859_v51, %v5828_v50 }
 0x9e5   : > { %3804 = vmatprep.mubr.f32.mxu0 %v1930_v41 }
 0x9e6   : > { %4231 = vmatpush3.bf16.msra.mxu0 %v4228_v21  ;;  %v4236_v47 = vpack.c.bf16 %v4691_v16, %v4690_v43 }
 0x9e7   : > { %4233 = vmatprep.subr.bf16.mxu0 %v4232_v42  ;;  %v4699_v48 = vpop.permute.xlu1 %4698 }
 0x9e8   : > { %v4701_v58 = vunpack.i.h.bf16 %v4699_v48  ;;  %v4700_v61 = vunpack.i.l.bf16 %v4699_v48 }
 0x9ea   : > { %4235 = vmatpush3.bf16.msra.mxu0 %v4232_v42  ;;  %v4284_v57 = vpack.c.bf16 %v4701_v58, %v4700_v61 }
 0x9eb   : > { %4237 = vmatprep.subr.bf16.mxu0 %v4236_v47 }
 0x9ee   : > { %4239 = vmatpush3.bf16.msra.mxu0 %v4236_v47 }
 0x9ef   : > { %4241 = vmatprep.subr.bf16.mxu0 %v4240_v49 }
 0x9f2   : > { %4243 = vmatpush3.bf16.msra.mxu0 %v4240_v49 }
 0x9f3   : > { %4285 = vmatprep.subr.bf16.mxu0 %v4284_v57 }
 0x9f5   : > { %3805 = vmatmul.mubr.f32.vlgmr.msra.gmra.mrb[22].mxu0 %v1932_v52 }
 0x9f6   : > { %4287 = vmatpush3.bf16.msra.mxu0 %v4284_v57 }
 0xa11   : > { %v2368_v53 = vpop.xlane.xlu0 %2367 }
 0xa12   : > { %v2371_v59 = vsub.f32 %v5858_v18, %v2368_v53 }
 0xa14   : > { %v2373_v62 = vmul.f32 1.442695, %v2371_v59 }
 0xa15   : > { %v2594_v5 = vpop.xlane.xlu0 %2593 }
 0xa16   : > { %4860 = vpow2.f32 %v2373_v62  ;;  %v2597_v11 = vsub.f32 %v5865_v24, %v2594_v5 }
 0xa18   : > { %v2370_v45 = vpop.xlane.xlu1 %2369  ;;  %v2599_v23 = vmul.f32 1.442695, %v2597_v11 }
 0xa19   : > { %v2372_v0 = vsub.f32 %v5854_v30, %v2370_v45  ;;  %v4704_v4 = vpop.permute.xlu0 %4703 }
 0xa1a   : > { %v4706_v38 = vunpack.i.h.bf16 %v4704_v4  ;;  %v4705_v40 = vunpack.i.l.bf16 %v4704_v4 }
 0xa1b   : > { %v2375_v60 = vmul.f32 1.442695, %v2372_v0 }
 0xa1c   : > { %v4320_v9 = vpack.c.bf16 %v4706_v38, %v4705_v40  ;;  %v2596_v10 = vpop.xlane.xlu1 %2595 }
 0xa1d   : > { %4862 = vpow2.f32 %v2375_v60  ;;  %v2598_v50 = vsub.f32 %v5862_v22, %v2596_v10  ;;  %v4714_v6 = vpop.permute.xlu0 %4713 }
 0xa1e   : > { %v4716_v31 = vunpack.i.h.bf16 %v4714_v6  ;;  %v4715_v18 = vunpack.i.l.bf16 %v4714_v6  ;;  %4321 = vmatprep.subr.bf16.mxu1 %v4320_v9 }
 0xa1f   : > { %v2601_v15 = vmul.f32 1.442695, %v2598_v50  ;;  %4323 = vmatpush3.bf16.msra.mxu1 %v4320_v9 }
 0xa20   : > { %v5911_v63 = vpop.eup %4860  ;;  %v4324_v30 = vpack.c.bf16 %v4716_v31, %v4715_v18  ;;  %v4709_v20 = vpop.permute.xlu1 %4708 }
 0xa21   : > { %4864 = vpow2.f32 %v2601_v15  ;;  %v4711_v25 = vunpack.i.h.bf16 %v4709_v20  ;;  %v4710_v26 = vunpack.i.l.bf16 %v4709_v20  ;;  %2377 = vadd.xlane.f32.xlu1 %v5911_v63  ;;  %v4724_v24 = vpop.permute.xlu0 %4723 }
 0xa22   : > { %v4726_v27 = vunpack.i.h.bf16 %v4724_v24  ;;  %v4725_v44 = vunpack.i.l.bf16 %v4724_v24  ;;  %4325 = vmatprep.subr.bf16.mxu1 %v4324_v30  ;;  %4866 = vpow2.f32 %v2599_v23 }
 0xa23   : > { %v4288_v22 = vpack.c.bf16 %v4711_v25, %v4710_v26  ;;  %4327 = vmatpush3.bf16.msra.mxu1 %v4324_v30 }
 0xa24   : > { %v4328_v2 = vpack.c.bf16 %v4726_v27, %v4725_v44  ;;  %v4719_v8 = vpop.permute.xlu1 %4718 }
 0xa25   : > { %v4721_v34 = vunpack.i.h.bf16 %v4719_v8  ;;  %v4720_v1 = vunpack.i.l.bf16 %v4719_v8  ;;  %4289 = vmatprep.subr.bf16.mxu0 %v4288_v22  ;;  %v4744_v3 = vpop.permute.xlu0 %4743 }
 0xa26   : > { %4291 = vmatpush3.bf16.msra.mxu0 %v4288_v22  ;;  %4329 = vmatprep.subr.bf16.mxu1 %v4328_v2  ;;  %v4746_v16 = vunpack.i.h.bf16 %v4744_v3  ;;  %v4745_v43 = vunpack.i.l.bf16 %v4744_v3  ;;  %v801_v3 = vld [vmem:[#allocation13 + $0x10] sm:$0xff] }
 0xa27   : > { %v5914_v36 = vpop.eup %4862  ;;  %v4292_v37 = vpack.c.bf16 %v4721_v34, %v4720_v1  ;;  %4331 = vmatpush3.bf16.msra.mxu1 %v4328_v2 }
 0xa28   : > { %v4729_v39 = vpop.permute.xlu1 %4728  ;;  %2379 = vadd.xlane.f32.xlu0 %v5914_v36  ;;  %v4336_v58 = vpack.c.bf16 %v4746_v16, %v4745_v43  ;;  %v805_v43 = vld [vmem:[#allocation13 + $0x30] sm:$0xff] }
 0xa29   : > { %v4731_v19 = vunpack.i.h.bf16 %v4729_v39  ;;  %v4730_v21 = vunpack.i.l.bf16 %v4729_v39  ;;  %4293 = vmatprep.subr.bf16.mxu0 %v4292_v37  ;;  %v4754_v33 = vpop.permute.xlu0 %4753 }
 0xa2a   : > { %4295 = vmatpush3.bf16.msra.mxu0 %v4292_v37  ;;  %v4756_v57 = vunpack.i.h.bf16 %v4754_v33  ;;  %v4755_v52 = vunpack.i.l.bf16 %v4754_v33  ;;  %v800_v37 = vld [vmem:[#allocation13 + $0x8] sm:$0xff]  ;;  %v806_v33 = vld [vmem:[#allocation13 + $0x38] sm:$0xff] }
 0xa2b   : > { %v5917_v17 = vpop.eup %4864  ;;  %v4296_v41 = vpack.c.bf16 %v4731_v19, %v4730_v21  ;;  %v802_v19 = vld [vmem:[#allocation13 + $0x18] sm:$0xff] }
 0xa2c   : > { %v4734_v42 = vpop.permute.xlu1 %4733  ;;  %2605 = vadd.xlane.f32.xlu0 %v5917_v17  ;;  %v5920_v47 = vpop.eup %4866  ;;  %v4340_v0 = vpack.c.bf16 %v4756_v57, %v4755_v52  ;;  %v4356_v21 = vpack.c.bf16 %v802_v19, %v801_v3  ;;  %v813_v52 = vld [vmem:[#allocation13 + $0x70] sm:$0xff] }
 0xa2d   : > { %v4736_v35 = vunpack.i.h.bf16 %v4734_v42  ;;  %v4735_v46 = vunpack.i.l.bf16 %v4734_v42  ;;  %4297 = vmatprep.subr.bf16.mxu0 %v4296_v41  ;;  %v4764_v53 = vpop.permute.xlu0 %4763  ;;  %v804_v42 = vld [vmem:[#allocation13 + $0x28] sm:$0xff] }
 0xa2e   : > { %4299 = vmatpush3.bf16.msra.mxu0 %v4296_v41  ;;  %v4766_v4 = vunpack.i.h.bf16 %v4764_v53  ;;  %v4765_v38 = vunpack.i.l.bf16 %v4764_v53  ;;  %v803_v41 = vld [vmem:[#allocation13 + $0x20] sm:$0xff]  ;;  %v814_v53 = vld [vmem:[#allocation13 + $0x78] sm:$0xff] }
 0xa2f   : > { %v4332_v48 = vpack.c.bf16 %v4736_v35, %v4735_v46  ;;  %v4360_v16 = vpack.c.bf16 %v804_v42, %v803_v41  ;;  %v807_v35 = vld [vmem:[#allocation13 + $0x40] sm:$0xff]  ;;  %v808_v46 = vld [vmem:[#allocation13 + $0x48] sm:$0xff] }
 0xa30   : > { %v4739_v49 = vpop.permute.xlu1 %4738  ;;  %2603 = vadd.xlane.f32.xlu0 %v5920_v47  ;;  %v4344_v11 = vpack.c.bf16 %v4766_v4, %v4765_v38 }
 0xa31   : > { %v4741_v61 = vunpack.i.h.bf16 %v4739_v49  ;;  %v4740_v51 = vunpack.i.l.bf16 %v4739_v49  ;;  %4333 = vmatprep.subr.bf16.mxu1 %v4332_v48  ;;  %v810_v49 = vld [vmem:[#allocation13 + $0x58] sm:$0xff] }
 0xa32   : > { %4768 = vrot.lane.b32.xlu1 %v5668_v7, %s5204_s20  ;;  %4335 = vmatpush3.bf16.msra.mxu1 %v4332_v48  ;;  %v809_v48 = vld [vmem:[#allocation13 + $0x50] sm:$0xff] }
 0xa33   : > { %v4300_v59 = vpack.c.bf16 %v4741_v61, %v4740_v51  ;;  %4337 = vmatprep.subr.bf16.mxu1 %v4336_v58  ;;  %v811_v61 = vld [vmem:[#allocation13 + $0x60] sm:$0xff]  ;;  %v812_v51 = vld [vmem:[#allocation13 + $0x68] sm:$0xff] }
 0xa34   : > { %v4749_v62 = vpop.permute.xlu1 %4748  ;;  %v4376_v57 = vpack.c.bf16 %v812_v51, %v811_v61 }
 0xa35   : > { %v4751_v5 = vunpack.i.h.bf16 %v4749_v62  ;;  %v4750_v45 = vunpack.i.l.bf16 %v4749_v62  ;;  %4301 = vmatprep.subr.bf16.mxu0 %v4300_v59 }
 0xa36   : > { %4778 = vrot.lane.b32.xlu1 %v4777_v32, %s5205_s3  ;;  %4303 = vmatpush3.bf16.msra.mxu0 %v4300_v59  ;;  %v4380_v59 = vpack.c.bf16 %v814_v53, %v813_v52 }
 0xa37   : > { %v4304_v40 = vpack.c.bf16 %v4751_v5, %v4750_v45  ;;  %4339 = vmatpush3.bf16.msra.mxu1 %v4336_v58  ;;  %v4372_v58 = vpack.c.bf16 %v810_v49, %v809_v48 }
 0xa38   : > { %4341 = vmatprep.subr.bf16.mxu1 %v4340_v0  ;;  %v4759_v60 = vpop.permute.xlu1 %4758 }
 0xa39   : > { %v4761_v9 = vunpack.i.h.bf16 %v4759_v60  ;;  %v4760_v10 = vunpack.i.l.bf16 %v4759_v60  ;;  %4305 = vmatprep.subr.bf16.mxu0 %v4304_v40 }
 0xa3a   : > { %4788 = vrot.lane.b32.xlu1 %v4787_v56, %s5203_s22  ;;  %4307 = vmatpush3.bf16.msra.mxu0 %v4304_v40 }
 0xa3b   : > { %v4308_v50 = vpack.c.bf16 %v4761_v9, %v4760_v10  ;;  %4343 = vmatpush3.bf16.msra.mxu1 %v4340_v0 }
 0xa3c   : > { %4345 = vmatprep.subr.bf16.mxu1 %v4344_v11 }
 0xa3d   : > { %4309 = vmatprep.subr.bf16.mxu0 %v4308_v50 }
 0xa3e   : > { %4798 = vrot.lane.b32.xlu1 %v4797_v14, %s5201_s28  ;;  %4311 = vmatpush3.bf16.msra.mxu0 %v4308_v50 }
 0xa3f   : > { %4347 = vmatpush3.bf16.msra.mxu1 %v4344_v11 }
 0xa42   : > { %v5937_v28 = vpop.f32.mrb[18].mxu0 }
 0xa43   : > { %v5939_v29 = vpop.f32.mrb[19].mxu0 }
 0xa46   : > { %4773 = vrot.lane.b32.xlu0 %v5668_v7, %s5205_s3 }
 0xa87   : > { %v3722_v32 = vpop.f32.mrb[20].mxu0 }
 0xa88   : > { %v1595_v54 = vpop.f32.mrb[21].mxu0 }
 0xa89   : > { %v4782_v55 = vpack.i.bf16 %v3722_v32, %v1595_v54 }
 0xa8b   : > { %4783 = vrot.lane.b32.xlu0 %v4782_v55, %s5204_s20 }
 0xaae   : > { %v2378_v56 = vpop.xlane.xlu1 %2377 }
 0xaaf   : > { %4868 = vrcp.f32 %v2378_v56 }
 0xab2   : > { %v4769_v6 = vpop.permute.xlu1 %4768 }
 0xab3   : > { %v4771_v31 = vunpack.i.h.bf16 %v4769_v6  ;;  %v4770_v12 = vunpack.i.l.bf16 %v4769_v6 }
 0xab5   : > { %v4312_v13 = vpack.c.bf16 %v4771_v31, %v4770_v12  ;;  %v2380_v14 = vpop.xlane.xlu0 %2379 }
 0xab6   : > { %4870 = vrcp.f32 %v2380_v14  ;;  %v4779_v40 = vpop.permute.xlu1 %4778 }
 0xab7   : > { %4313 = vmatprep.subr.bf16.mxu0 %v4312_v13  ;;  %v4781_v9 = vunpack.i.h.bf16 %v4779_v40  ;;  %v4780_v10 = vunpack.i.l.bf16 %v4779_v40 }
 0xab8   : > { %4315 = vmatpush3.bf16.msra.mxu0 %v4312_v13 }
 0xab9   : > { %v4869_v18 = vpop.eup %4868  ;;  %v2606_v15 = vpop.xlane.xlu0 %2605  ;;  %v2794_v55 = vsel %vm961_vm0, %v5939_v29, %v4780_v10  ;;  %v2795_v56 = vsel %vm961_vm0, %v5937_v28, %v4781_v9 }
 0xaba   : > { %v2382_v30 = vmul.f32 %v4869_v18, %v5911_v63  ;;  %4872 = vrcp.f32 %v2606_v15  ;;  %v4789_v11 = vpop.permute.xlu1 %4788 }
 0xabb   : > { %v4791_v14 = vunpack.i.h.bf16 %v4789_v11  ;;  %v4790_v18 = vunpack.i.l.bf16 %v4789_v11 }
 0xabc   : > { %3888 = vmatprep.mubr.f32.mxu0 %v2382_v30 }
 0xabd   : > { %v2604_v7 = vpop.xlane.xlu0 %2603 }
 0xabe   : > { %4874 = vrcp.f32 %v2604_v7  ;;  %v4799_v30 = vpop.permute.xlu1 %4798 }
 0xabf   : > { %v4800_v28 = vunpack.i.l.bf16 %v4799_v30 }
 0xac0   : > { %v4871_v20 = vpop.eup %4870 }
 0xac1   : > { %v4774_v23 = vpop.permute.xlu0 %4773  ;;  %v2384_v25 = vmul.f32 %v4871_v20, %v5914_v36  ;;  %v799_v36 = vld [vmem:[#allocation13] sm:$0xff] }
 0xac2   : > { %v4776_v26 = vunpack.i.h.bf16 %v4774_v23  ;;  %v4775_v24 = vunpack.i.l.bf16 %v4774_v23  ;;  %v4352_v39 = vpack.c.bf16 %v800_v37, %v799_v36 }
 0xac3   : > { %3889 = vmatmul.mubr.f32.vlgmr.msra.gmra.mrb[24].mxu0 %v2384_v25 }
 0xac4   : > { %v4348_v27 = vpack.c.bf16 %v4776_v26, %v4775_v24  ;;  %v4873_v44 = vpop.eup %4872  ;;  %4353 = vmatprep.subr.bf16.mxu0 %v4352_v39  ;;  %v4801_v24 = vunpack.i.h.bf16 %v4799_v30 }
 0xac5   : > { %v2610_v1 = vmul.f32 %v4873_v44, %v5917_v17  ;;  %4355 = vmatpush3.bf16.msra.mxu0 %v4352_v39  ;;  %v4364_v17 = vpack.c.bf16 %v806_v33, %v805_v43 }
 0xac6   : > { %4349 = vmatprep.subr.bf16.mxu1 %v4348_v27  ;;  %4357 = vmatprep.subr.bf16.mxu0 %v4356_v21 }
 0xac7   : > { %4351 = vmatpush3.bf16.msra.mxu1 %v4348_v27 }
 0xac8   : > { %v4875_v22 = vpop.eup %4874  ;;  %v3806_v2 = vpop.f32.mrb[22].mxu0 }
 0xac9   : > { %v2047_v8 = vpop.f32.mrb[23].mxu0  ;;  %v2608_v63 = vmul.f32 %v4875_v22, %v5920_v47  ;;  %4359 = vmatpush3.bf16.msra.mxu0 %v4356_v21  ;;  %v4368_v47 = vpack.c.bf16 %v808_v46, %v807_v35 }
 0xaca   : > { %v4792_v34 = vpack.i.bf16 %v3806_v2, %v2047_v8  ;;  %4361 = vmatprep.subr.bf16.mxu0 %v4360_v16 }
 0xacb   : > { %3930 = vmatprep.mubr.f32.mxu1 %v2608_v63 }
 0xacc   : > { %3931 = vmatmul.mubr.f32.vlgmr.msra.gmra.mrb[38].mxu1 %v2610_v1  ;;  %4793 = vrot.lane.b32.xlu0 %v4792_v34, %s5202_s8 }
 0xacd   : > { %4363 = vmatpush3.bf16.msra.mxu0 %v4360_v16 }
 0xace   : > { %4365 = vmatprep.subr.bf16.mxu0 %v4364_v17 }
 0xad1   : > { %4367 = vmatpush3.bf16.msra.mxu0 %v4364_v17 }
 0xad2   : > { %4369 = vmatprep.subr.bf16.mxu0 %v4368_v47 }
 0xad5   : > { %4371 = vmatpush3.bf16.msra.mxu0 %v4368_v47 }
 0xad6   : > { %4373 = vmatprep.subr.bf16.mxu0 %v4372_v58 }
 0xad9   : > { %4375 = vmatpush3.bf16.msra.mxu0 %v4372_v58 }
 0xada   : > { %4377 = vmatprep.subr.bf16.mxu0 %v4376_v57 }
 0xadd   : > { %4379 = vmatpush3.bf16.msra.mxu0 %v4376_v57 }
 0xade   : > { %4381 = vmatprep.subr.bf16.mxu0 %v4380_v59 }
 0xae1   : > { %4383 = vmatpush3.bf16.msra.mxu0 %v4380_v59 }
 0xafd   : > { %v4784_v60 = vpop.permute.xlu0 %4783 }
 0xafe   : > { %v4786_v50 = vunpack.i.h.bf16 %v4784_v60  ;;  %v4785_v32 = vunpack.i.l.bf16 %v4784_v60 }
 0xb00   : > { %v2798_v6 = vsel %vm2796_vm1, %v2795_v56, %v4786_v50  ;;  %v2797_v31 = vsel %vm2796_vm1, %v2794_v55, %v4785_v32 }
 0xb01   : > { %v2800_v7 = vsel %vm2799_vm2, %v2797_v31, %v4790_v18  ;;  %v2801_v20 = vsel %vm2799_vm2, %v2798_v6, %v4791_v14 }
 0xb3e   : > { %v4794_v54 = vpop.permute.xlu0 %4793 }
 0xb3f   : > { %v4796_v12 = vunpack.i.h.bf16 %v4794_v54  ;;  %v4795_v13 = vunpack.i.l.bf16 %v4794_v54 }
 0xb41   : > { %v2804_v23 = vsel %vm2802_vm3, %v2801_v20, %v4796_v12  ;;  %v2803_v25 = vsel %vm2802_vm3, %v2800_v7, %v4795_v13 }
 0xb42   : > { %v2807_v44 = vsel %vm2805_vm4, %v2804_v23, %v4801_v24  ;;  %v2806_v8 = vsel %vm2805_vm4, %v2803_v25, %v4800_v28 }
 0xb96   : > { %v3890_v62 = vpop.f32.mrb[24].mxu0 }
 0xb97   : > { %v2499_v5 = vpop.f32.mrb[25].mxu0 }
 0xb98   : > { %v4802_v45 = vpack.i.bf16 %v3890_v62, %v2499_v5 }
 0xb9a   : > { %4803 = vrot.lane.b32.xlu0 %v4802_v45, %s5200_s30 }
 0xb9f   : > { %v3932_v0 = vpop.f32.mrb[38].mxu1 }
 0xba0   : > { %v2725_v4 = vpop.f32.mrb[39].mxu1 }
 0xba1   : > { %v4807_v38 = vpack.i.bf16 %v3932_v0, %v2725_v4 }
 0xba3   : > { %4808 = vrot.lane.b32.xlu1 %v4807_v38, %s5199_s15 }
 0xc0c   : > { %v4804_v15 = vpop.permute.xlu0 %4803 }
 0xc0d   : > { %v4806_v26 = vunpack.i.h.bf16 %v4804_v15  ;;  %v4805_v29 = vunpack.i.l.bf16 %v4804_v15 }
 0xc0f   : > { %v2810_v63 = vsel %vm2808_vm5, %v2807_v44, %v4806_v26  ;;  %v2809_v34 = vsel %vm2808_vm5, %v2806_v8, %v4805_v29 }
 0xc15   : > { %v4809_v27 = vpop.permute.xlu1 %4808 }
 0xc16   : > { %v4811_v22 = vunpack.i.h.bf16 %v4809_v27  ;;  %v4810_v2 = vunpack.i.l.bf16 %v4809_v27 }
 0xc18   : > { %v2812_v1 = vsel %vm2811_vm6, %v2809_v34, %v4810_v2  ;;  %v2813_v36 = vsel %vm2811_vm6, %v2810_v63, %v4811_v22 }
 0xc19   : > { %3965 = vmatprep.mubr.f32.mxu0 %v2812_v1 }
 0xc1a   : > { %3966 = vmatmul.mubr.f32.vlgmr.msra.gmra.mrb[26].mxu0 %v2813_v36 }
 0xc1b   : > { %5091 = shalt.err (!%p5088_p12)
}
 0xc1c   : > { %s5092_s24 = scalar_lea.hbm %s5964_s23, 256  ;;  %s5096_s30 = scalar_lea.hbm %s6125_s21, 512 }
 0xc1d   : > { %p5093_p8 = scmp.ne.s32.totalorder %s5964_s23, %s5092_s24  ;;  %p5097_p1 = scmp.lt.u32.totalorder %s5964_s23, %s6125_s21 }
 0xc1e   : > { %p5098_p6 = scmp.lt.u32.totalorder %s5096_s30, %s5092_s24  ;;  %p5100_p5 = scmp.lt.u32.totalorder %s5092_s24, %s5964_s23 }
 0xc1f   : > { %p5094_p10 = pnand %p5093_p8, %p6126_p2 }
 0xc20   : > { %p5099_p3 = por %p5098_p6, %p5097_p1 }
 0xc21   : > { %p5095_p4 = pneg %p5094_p10 }
 0xc22   : > { %p5101_p0 = por %p5100_p5, %p5099_p3 }
 0xc24   : > { %p5102_p11 = pnand %p5101_p0, %p5095_p4 }
 0xc26   : > { %5105 = shalt.err (!%p5102_p11)
}
 0xc27   : > { %s5207_s22 = smov 128   ;;  %s5208_s20 = smov 8  }
 0xc28   : > { %4407 = dma.vmem_to_hbm [thread:$0]  (%p6126_p2), %s5956_s26, 256, %s5964_s23, %s2903_s19, %s5207_s22, %s5207_s22, %s5208_s20  }
 0xc29   : > { %s6127_s14 = sld [smem:[#allocation32_spill]]  ;;  %s489_s25 = scalar_lea.vmem [#allocation14], %s5564_s7 }
 0xc2a   : > { %s2916_s5 = sshll.u32 %s489_s25, 4  ;;  %s6128_s29 = sld [smem:[#allocation33_spill]]  ;;  %s5997_s5 = int_to_ptr.vmem [resolvable:$true] %s2916_s5 }
 0xc2b   : > { %s2898_s23 = scalar_lea.sflag [#allocation4], %s5561_s16  ;;  %s5106_s7 = scalar_lea.vmem %s5997_s5, 256 }
 0xc2c   : > { %p5107_p13 = scmp.ne.s32.totalorder %s5997_s5, %s5106_s7  ;;  %s5209_s19 = smov [#allocation14]  }
 0xc2d   : > { %s5110_s24 = sshll.u32 %s5209_s19, 4  ;;  %s5111_s24 = int_to_ptr.vmem [resolvable:$false] %s5110_s24 }
 0xc2e   : > { %p5108_p7 = pnand %p5107_p13, %p6126_p2  ;;  %s5112_s18 = scalar_lea.vmem %s5111_s24, 512 }
 0xc2f   : > { %v3160_v37 = vld [vmem:[%s6127_s14] ss:$0 sm:$0xff]  ;;  %p5113_p12 = scmp.lt.s32.totalorder %s5997_s5, %s5111_s24  ;;  %p5114_p8 = scmp.lt.s32.totalorder %s5112_s18, %s5106_s7 }
 0xc30   : > { %s6004_s26 = scalar_lea.hbm %s6128_s29, %s3172_s27  ;;  %p5109_p9 = pneg %p5108_p7 }
 0xc31   : > { %p5115_p10 = por %p5114_p8, %p5113_p12 }
 0xc33   : > { %p5116_p4 = pnand %p5115_p10, %p5109_p9 }
 0xced   : > { %v3967_v3 = vpop.f32.mrb[26].mxu0 }
 0xcee   : > { %v2892_v39 = vadd.f32 %v3967_v3, %v3160_v37  ;;  %v2886_v19 = vpop.f32.mrb[27].mxu0 }
 0xcef   : > { %v2887_v21 = vadd.f32 %v3160_v37, %v2886_v19 }
 0xcf0   : > { %2896 = vst [vmem:[%s489_s25 + $0x8] sm:$0xff] %v2892_v39 }
 0xcf1   : > { %2895 = vst [vmem:[%s489_s25] sm:$0xff] %v2887_v21 }
 0xcf2   : > { %5119 = shalt.err (!%p5116_p4)
}
 0xcf3   : > { %s5120_s13 = scalar_lea.hbm %s6004_s26, 256  ;;  %s5124_s30 = scalar_lea.hbm %s6128_s29, 512 }
 0xcf4   : > { %p5121_p1 = scmp.ne.s32.totalorder %s6004_s26, %s5120_s13  ;;  %p5125_p5 = scmp.lt.u32.totalorder %s6004_s26, %s6128_s29 }
 0xcf5   : > { %p5126_p0 = scmp.lt.u32.totalorder %s5124_s30, %s5120_s13  ;;  %p5128_p13 = scmp.lt.u32.totalorder %s5120_s13, %s6004_s26 }
 0xcf6   : > { %p5122_p6 = pnand %p5121_p1, %p6126_p2 }
 0xcf7   : > { %p5127_p11 = por %p5126_p0, %p5125_p5 }
 0xcf8   : > { %p5123_p3 = pneg %p5122_p6 }
 0xcf9   : > { %p5129_p7 = por %p5128_p13, %p5127_p11 }
 0xcfb   : > { %p5130_p9 = pnand %p5129_p7, %p5123_p3 }
 0xcfd   : > { %5133 = shalt.err (!%p5130_p9)
}
 0xcfe   : > { %4406 = dma.vmem_to_hbm [thread:$0]  (%p6126_p2), %s5997_s5, 256, %s6004_s26, %s2898_s23, %s5207_s22, %s5207_s22, %s5208_s20  }
 0xcff PF: > { %s6129_s3 = sld [smem:[#allocation23_spill]]  ;;  %s6130_s9 = sld [smem:[#allocation25_spill]] }
 0xd00   : > { %p6132_p8 = scmp.ge.s32.totalorder %s5188_s12, 2 }
 0xd05   : > { %s2947_s14 = sand.u32 1, %s6129_s3   ;;  %p6131_p12 = scmp.ne.s32.totalorder %s6130_s9, 0 }
 0xd06   : > { %s2948_s25 = scalar_lea.sflag [#allocation4], %s2947_s14 }
 0xd07   : > { %p4434_p10 = pnand %p6132_p8, %p6131_p12 }
 0xd09   : > { %5167 = dma.done.wait (!%p4434_p10), %s2948_s25, 256  }
 0xd0a   : > { %5169 = vsyncadd (!%p4434_p10), %s2948_s25, 4294967040  ;;  %s2957_s1 = scalar_lea.sflag [#allocation16], %s2947_s14 }
 0xd0b   : > { %5171 = dma.done.wait (!%p4434_p10), %s2957_s1, 256  }
 0xd0c   : > { %5173 = vsyncadd (!%p4434_p10), %s2957_s1, 4294967040  ;;  %s6133_s12 = sld [smem:[#allocation26_spill]]  ;;  %s6134_s16 = sld [smem:[#allocation24_spill]] }
 0xd0d   : > { %s6135_s11 = sld [smem:[#allocation28_spill]]  ;;  %s6136_s30 = smov %s5180_s10 }
 0xd12   : > { %p31_p2 = scmp.ge.s32.totalorder %s6133_s12, 4   ;;  %s6137_s10 = smov %s6134_s16 }
 0xd14   :  { %33 = sbr.rel (!%p31_p2) target bundleno = 18 (0x12), region = 154 }
 0xd1b   :  { %2962 = vsyncpa [#allocation3], 1 }
 0xd1c   :  { %2964 = vsyncpa [#allocation3 + $0x1], 1 }
 0xd1d   :  { %2965 = vsyncpa [#allocation6], 1 }
 0xd1e   :  { %2967 = vsyncpa [#allocation6 + $0x1], 1 }
 0xd1f   :  { %2968 = vsyncpa [#allocation9], 1 }
 0xd20   :  { %2969 = vsyncpa [#allocation12], 1 }
 0xd21   :  { %2970 = vsyncpa [#allocation4], 1 }
 0xd22   :  { %2972 = vsyncpa [#allocation4 + $0x1], 1 }
 0xd23   :  { %2973 = vsyncpa [#allocation16], 1 }
 0xd24   :  { %2975 = vsyncpa [#allocation16 + $0x1], 1 }

</bundles_post_ra>
